<compile_context>
chip_gen: v7x
topology: tpu7x:2x2x1
jax: 0.10.0
libtpu: 0.0.40
codegen_flags: <defaults>
</compile_context>

<pallas_src>
import functools

import numpy as np
import jax
import jax.numpy as jnp
from jax import lax
from jax.experimental import pallas as pl
from jax.experimental.pallas import tpu as pltpu


# ---------------------------------------------------------------------------
# Fused forward kernel (one batch tile of `tb` images per grid step)
# ---------------------------------------------------------------------------
def _fused_cnn_kernel(x_ref, w1b_ref, b1_ref, w2b_ref, b2_ref, sel_ref,
                      wfc1_ref, bfc1_ref, wfc2_ref, bfc2_ref,
                      wout_ref, bout_ref, o_ref):
    f32 = jnp.float32

    def shift_rows(a, k):
        # a'[r] = a[(r + k) % R].  Wrapped / cross-image rows only land in
        # "garbage" rows that are never consumed (see invariant at file top),
        # so no masking is needed.  XLU rotate -> essentially free.
        if k == 0:
            return a
        return pltpu.roll(a, (-k) % a.shape[0], axis=0)

    x = x_ref[...]                                        # (R, 28), R = tb*28

    # ---- conv1 (1->6, 5x5) + bias + relu: 5 banded matmuls (one / kernel row)
    acc = jnp.dot(x, w1b_ref[0], preferred_element_type=f32)
    for ki in range(1, 5):
        acc = acc + jnp.dot(shift_rows(x, ki), w1b_ref[ki],
                            preferred_element_type=f32)
    y = jnp.maximum(acc + b1_ref[...], 0.0)               # (R, 144)

    # ---- maxpool1 2x2: width = parity lane-halves, height = row r vs r+1
    y = jnp.maximum(y[:, 0:72], y[:, 72:144])             # (R, 72)
    y = jnp.maximum(y, shift_rows(y, 1))                  # valid rows b*28+2*ph

    # ---- conv2 (6->16, 5x5) + bias + relu (same banded-matmul scheme)
    acc = jnp.dot(y, w2b_ref[0], preferred_element_type=f32)
    for ki in range(1, 5):
        acc = acc + jnp.dot(shift_rows(y, 2 * ki), w2b_ref[ki],
                            preferred_element_type=f32)
    z = jnp.maximum(acc + b2_ref[...], 0.0)               # (R, 128)

    # ---- maxpool2 2x2
    z = jnp.maximum(z[:, 0:64], z[:, 64:128])             # (R, 64)
    z = jnp.maximum(z, shift_rows(z, 2))                  # valid rows b*28+4*t

    # ---- fc1: gather the 4 valid rows per image with precomputed one-hot
    # selection matmuls (pure MXU work), concat to (tb, 256), one K=256 matmul.
    slabs = [jnp.dot(sel_ref[t], z, preferred_element_type=f32)
             for t in range(4)]                           # 4 x (tb, 64)
    slab = jnp.concatenate(slabs, axis=1)                 # (tb, 256)
    h = jnp.maximum(jnp.dot(slab, wfc1_ref[...], preferred_element_type=f32)
                    + bfc1_ref[...], 0.0)                 # (tb, 128) lane-padded

    # ---- fc2 + relu, output layer (all lane-padded to 128 -> unmasked stores)
    h = jnp.maximum(jnp.dot(h, wfc2_ref[...], preferred_element_type=f32)
                    + bfc2_ref[...], 0.0)                 # (tb, 128)
    out = jnp.dot(h, wout_ref[...], preferred_element_type=f32) + bout_ref[...]
    o_ref[...] = out.astype(o_ref.dtype)


# ---------------------------------------------------------------------------
# One-time weight preparation (outside jit): banded conv matrices + folded,
# lane-padded FC weights.
# ---------------------------------------------------------------------------
def prepare_params(params):
    f32 = jnp.float32
    w1 = params["conv1_w"].astype(f32)                    # (6,1,5,5)  OIHW
    b1 = params["conv1_b"].astype(f32)
    w2 = params["conv2_w"].astype(f32)                    # (16,6,5,5)
    b2 = params["conv2_b"].astype(f32)

    # conv1 band: w1b[ki, w_in, parity*72+q*6+oc] = w1[oc,0,ki, w_in-(2q+parity)]
    band1 = jnp.transpose(w1[:, 0], (1, 2, 0))            # (ki, kj, oc)
    w_in = jnp.arange(28)[:, None]
    ow = jnp.arange(24)[None, :]
    kj = w_in - ow
    m = band1[:, jnp.clip(kj, 0, 4), :]                   # (5,28,24,6)
    m = jnp.where(((kj >= 0) & (kj < 5))[None, :, :, None], m, 0.0)
    w1b = m.reshape(5, 28, 12, 2, 6).transpose(0, 1, 3, 2, 4).reshape(5, 28, 144)
    b1t = jnp.tile(b1, 24)[None, :]                       # (1,144)

    # conv2 band: rows = pw*6+ic (matches pooled conv1 layout),
    #             cols = parity*64 + q2*16 + oc
    band2 = jnp.transpose(w2, (2, 3, 1, 0))               # (ki, kj, ic, oc)
    pw = jnp.arange(12)[:, None]
    ow2 = jnp.arange(8)[None, :]
    kj2 = pw - ow2
    m2 = band2[:, jnp.clip(kj2, 0, 4), :, :]              # (5,12,8,6,16)
    m2 = jnp.where(((kj2 >= 0) & (kj2 < 5))[None, :, :, None, None], m2, 0.0)
    m2 = m2.transpose(0, 1, 3, 2, 4).reshape(5, 72, 8, 16)
    w2b = m2.reshape(5, 72, 4, 2, 16).transpose(0, 1, 3, 2, 4).reshape(5, 72, 128)
    b2t = jnp.tile(b2, 8)[None, :]                        # (1,128)

    # fc1: fold PyTorch (C,H,W) flatten + our (ph; pw*16+oc) feature layout;
    # flatten to a single (256, 128) matrix (output lane-padded 120 -> 128).
    wfc1 = params["fc1_w"].astype(f32).reshape(120, 16, 4, 4)   # (n, oc, ph, pw)
    wfc1 = jnp.transpose(wfc1, (2, 3, 1, 0)).reshape(256, 120)  # row = ph*64+pw*16+oc
    wfc1 = jnp.pad(wfc1, ((0, 0), (0, 8)))                      # (256, 128)
    bfc1 = jnp.pad(params["fc1_b"].astype(f32), (0, 8))[None, :]

    wfc2 = jnp.pad(params["fc2_w"].astype(f32).T, ((0, 8), (0, 44)))   # (128,128)
    bfc2 = jnp.pad(params["fc2_b"].astype(f32), (0, 44))[None, :]

    out_nbr = params["out_w"].shape[0]
    npad = ((out_nbr + 127) // 128) * 128
    wout = jnp.pad(params["out_w"].astype(f32).T,
                   ((0, 44), (0, npad - out_nbr)))                     # (128,npad)
    bout = jnp.pad(params["out_b"].astype(f32), (0, npad - out_nbr))[None, :]

    return dict(w1b=w1b, b1=b1t, w2b=w2b, b2=b2t, wfc1=wfc1, bfc1=bfc1,
                wfc2=wfc2, bfc2=bfc2, wout=wout, bout=bout)


# ---------------------------------------------------------------------------
# Batch-tile selection: biggest tile that still leaves >=2 grid steps so the
# "parallel" grid axis can be split across v7x's two TensorCores.  tb is even
# so the (tb*28, .) blocks keep an 8-divisible sublane count.
# ---------------------------------------------------------------------------
def _pick_tb(batch):
    for tb in (64, 32, 16, 8, 4, 2):
        if batch >= 2 * tb:
            return tb
    return 2


# ---------------------------------------------------------------------------
# Forward pass (matches Cnn.forward semantics) — one fused pallas_call
# ---------------------------------------------------------------------------
def cnn_forward(x, prep, *, out_nbr):
    x = x.reshape(-1, 28, 28).astype(jnp.float32)   # x.view(-1, 1, 28, 28), C==1
    B = x.shape[0]
    npad = prep["bout"].shape[-1]

    tb = _pick_tb(B)
    steps = -(-B // tb)
    Bp = steps * tb
    if Bp != B:
        x = jnp.concatenate([x, jnp.zeros((Bp - B, 28, 28), jnp.float32)], axis=0)
    x2d = x.reshape(Bp * 28, 28)
    R = tb * 28

    # One-hot fc1 row-selection matrices (identical every grid step) -> host
    # constant, fetched once via a constant index_map.
    sel = np.zeros((4, tb, R), np.float32)
    bidx = np.arange(tb)
    for t in range(4):
        sel[t, bidx, bidx * 28 + 4 * t] = 1.0
    sel = jnp.asarray(sel)

    flops = 2 * steps * (5 * R * 28 * 144 + 5 * R * 72 * 128
                         + 4 * tb * R * 64 + tb * 256 * 128
                         + tb * 128 * 128 + tb * 128 * npad)
    weight_bytes = sum(4 * int(np.prod(prep[k].shape)) for k in
                       ("w1b", "b1", "w2b", "b2", "wfc1", "bfc1",
                        "wfc2", "bfc2", "wout", "bout"))
    bytes_accessed = 4 * (Bp * 28 * 28 + Bp * npad) + 4 * int(sel.size) + weight_bytes
    cost = pl.CostEstimate(flops=flops, transcendentals=0,
                           bytes_accessed=bytes_accessed)

    out = pl.pallas_call(
        _fused_cnn_kernel,
        out_shape=jax.ShapeDtypeStruct((Bp, npad), jnp.float32),
        grid=(steps,),
        in_specs=[
            pl.BlockSpec((R, 28), lambda i: (i, 0)),           # input batch tile
            pl.BlockSpec((5, 28, 144), lambda i: (0, 0, 0)),   # conv1 band
            pl.BlockSpec((1, 144), lambda i: (0, 0)),          # conv1 bias (tiled)
            pl.BlockSpec((5, 72, 128), lambda i: (0, 0, 0)),   # conv2 band
            pl.BlockSpec((1, 128), lambda i: (0, 0)),          # conv2 bias (tiled)
            pl.BlockSpec((4, tb, R), lambda i: (0, 0, 0)),     # fc1 row gather
            pl.BlockSpec((256, 128), lambda i: (0, 0)),        # fc1 (K=256, padded)
            pl.BlockSpec((1, 128), lambda i: (0, 0)),          # fc1 bias
            pl.BlockSpec((128, 128), lambda i: (0, 0)),        # fc2 (padded)
            pl.BlockSpec((1, 128), lambda i: (0, 0)),          # fc2 bias
            pl.BlockSpec((128, npad), lambda i: (0, 0)),       # output layer
            pl.BlockSpec((1, npad), lambda i: (0, 0)),         # output bias
        ],
        out_specs=pl.BlockSpec((tb, npad), lambda i: (i, 0)),
        compiler_params=pltpu.CompilerParams(
            dimension_semantics=("parallel",),
            vmem_limit_bytes=32 * 1024 * 1024),
        cost_estimate=cost,
    )(x2d, prep["w1b"], prep["b1"], prep["w2b"], prep["b2"], sel,
      prep["wfc1"], prep["bfc1"], prep["wfc2"], prep["bfc2"],
      prep["wout"], prep["bout"])
    return out[:B, :out_nbr]


# ---------------------------------------------------------------------------
# Deterministic parameter init (PyTorch default: U(-1/sqrt(fan_in), 1/sqrt(fan_in)))
# ---------------------------------------------------------------------------
def init_params(key, output_nbr):
    def uni(k, shape, fan_in):
        bound = 1.0 / float(fan_in) ** 0.5
        return jax.random.uniform(k, shape, jnp.float32, -bound, bound)

    ks = jax.random.split(key, 10)
    return {
        "conv1_w": uni(ks[0], (6, 1, 5, 5), 1 * 5 * 5),
        "conv1_b": uni(ks[1], (6,), 1 * 5 * 5),
        "conv2_w": uni(ks[2], (16, 6, 5, 5), 6 * 5 * 5),
        "conv2_b": uni(ks[3], (16,), 6 * 5 * 5),
        "fc1_w":   uni(ks[4], (120, 16 * 4 * 4), 16 * 4 * 4),
        "fc1_b":   uni(ks[5], (120,), 16 * 4 * 4),
        "fc2_w":   uni(ks[6], (84, 120), 120),
        "fc2_b":   uni(ks[7], (84,), 120),
        "out_w":   uni(ks[8], (output_nbr, 84), 84),
        "out_b":   uni(ks[9], (output_nbr,), 84),
    }


# ---------------------------------------------------------------------------
# Pure-JAX reference (sanity check only)
# ---------------------------------------------------------------------------
def reference_forward(x, params):
    x = x.reshape(-1, 1, 28, 28).astype(jnp.float32)

    def conv(x, w, b):
        y = lax.conv_general_dilated(
            x, w, (1, 1), "VALID",
            dimension_numbers=("NCHW", "OIHW", "NCHW"),
            precision=lax.Precision.HIGHEST)
        return jax.nn.relu(y + b[None, :, None, None])

    def pool(x):
        return lax.reduce_window(x, -jnp.inf, lax.max,
                                 (1, 1, 2, 2), (1, 1, 2, 2), "VALID")

    x = pool(conv(x, params["conv1_w"], params["conv1_b"]))
    x = pool(conv(x, params["conv2_w"], params["conv2_b"]))
    x = x.reshape(x.shape[0], -1)
    x = jax.nn.relu(jnp.dot(x, params["fc1_w"].T,
                            precision=lax.Precision.HIGHEST) + params["fc1_b"])
    x = jax.nn.relu(jnp.dot(x, params["fc2_w"].T,
                            precision=lax.Precision.HIGHEST) + params["fc2_b"])
    return jnp.dot(x, params["out_w"].T,
                   precision=lax.Precision.HIGHEST) + params["out_b"]


if __name__ == "__main__":
    output_nbr = 10

    key = jax.random.PRNGKey(0)
    k_x, k_p, k_x2 = jax.random.split(key, 3)
    params = init_params(k_p, output_nbr)
    prep = prepare_params(params)          # one-time weight rework (outside jit)

    fwd = jax.jit(functools.partial(cnn_forward, out_nbr=output_nbr))

    # Small batch (single grid step).
    x = jax.random.normal(k_x, (2, 1, 28, 28), dtype=jnp.float32)
    out = jax.block_until_ready(fwd(x, prep))
    assert out.shape == (2, output_nbr), out.shape
    ref = jax.block_until_ready(reference_forward(x, params))
    assert jnp.allclose(out, ref, rtol=1e-2, atol=1e-2), (out, ref)

    # Larger, non-multiple batch: exercises batch padding + multi-step
    # "parallel" grid (and the adaptive tile size).
    x2 = jax.random.normal(k_x2, (37, 1, 28, 28), dtype=jnp.float32)
    out2 = jax.block_until_ready(fwd(x2, prep))
    assert out2.shape == (37, output_nbr), out2.shape
    ref2 = jax.block_until_ready(reference_forward(x2, params))
    assert jnp.allclose(out2, ref2, rtol=1e-2, atol=1e-2), (out2, ref2)

    print("KERNEL_OK")
</pallas_src>

<mosaic_0001>
module attributes {stable_mosaic.version = 11 : i64} {
  func.func @_fused_cnn_kernel(%arg0: i32, %arg1: memref<56x28xf32, #tpu.memory_space<vmem>>, %arg2: memref<5x28x144xf32, #tpu.memory_space<vmem>>, %arg3: memref<1x144xf32, #tpu.memory_space<vmem>>, %arg4: memref<5x72x128xf32, #tpu.memory_space<vmem>>, %arg5: memref<1x128xf32, #tpu.memory_space<vmem>>, %arg6: memref<4x2x56xf32, #tpu.memory_space<vmem>>, %arg7: memref<256x128xf32, #tpu.memory_space<vmem>>, %arg8: memref<1x128xf32, #tpu.memory_space<vmem>>, %arg9: memref<128x128xf32, #tpu.memory_space<vmem>>, %arg10: memref<1x128xf32, #tpu.memory_space<vmem>>, %arg11: memref<128x128xf32, #tpu.memory_space<vmem>>, %arg12: memref<1x128xf32, #tpu.memory_space<vmem>>, %arg13: memref<2x128xf32, #tpu.memory_space<vmem>>) attributes {dimension_semantics = [#tpu.dimension_semantics<parallel>], iteration_bounds = array<i64: 1>, scalar_prefetch = 0 : i64, scratch_operands = 0 : i64, tpu.core_type = #tpu.core_type<tc>, window_params = [{transform_indices = @transform_0, window_bounds = array<i64: 56, 28>}, {pipeline_mode = #tpu.pipeline_mode<synchronous>, transform_indices = @transform_1, window_bounds = array<i64: 5, 28, 144>}, {pipeline_mode = #tpu.pipeline_mode<synchronous>, transform_indices = @transform_2, window_bounds = array<i64: 1, 144>}, {pipeline_mode = #tpu.pipeline_mode<synchronous>, transform_indices = @transform_3, window_bounds = array<i64: 5, 72, 128>}, {pipeline_mode = #tpu.pipeline_mode<synchronous>, transform_indices = @transform_4, window_bounds = array<i64: 1, 128>}, {pipeline_mode = #tpu.pipeline_mode<synchronous>, transform_indices = @transform_5, window_bounds = array<i64: 4, 2, 56>}, {pipeline_mode = #tpu.pipeline_mode<synchronous>, transform_indices = @transform_6, window_bounds = array<i64: 256, 128>}, {pipeline_mode = #tpu.pipeline_mode<synchronous>, transform_indices = @transform_7, window_bounds = array<i64: 1, 128>}, {pipeline_mode = #tpu.pipeline_mode<synchronous>, transform_indices = @transform_8, window_bounds = array<i64: 128, 128>}, {pipeline_mode = #tpu.pipeline_mode<synchronous>, transform_indices = @transform_9, window_bounds = array<i64: 1, 128>}, {pipeline_mode = #tpu.pipeline_mode<synchronous>, transform_indices = @transform_10, window_bounds = array<i64: 128, 128>}, {pipeline_mode = #tpu.pipeline_mode<synchronous>, transform_indices = @transform_11, window_bounds = array<i64: 1, 128>}, {transform_indices = @transform_12, window_bounds = array<i64: 2, 128>}]} {
    %c0 = arith.constant 0 : index
    %c0_0 = arith.constant 0 : index
    %0 = vector.load %arg1[%c0, %c0_0] : memref<56x28xf32, #tpu.memory_space<vmem>>, vector<56x28xf32>
    %c0_1 = arith.constant 0 : index
    %c0_2 = arith.constant 0 : index
    %c0_3 = arith.constant 0 : index
    %1 = vector.load %arg2[%c0_1, %c0_2, %c0_3] : memref<5x28x144xf32, #tpu.memory_space<vmem>>, vector<1x28x144xf32>
    %2 = vector.shape_cast %1 : vector<1x28x144xf32> to vector<28x144xf32>
    %cst = arith.constant dense<0.000000e+00> : vector<56x144xf32>
    %3 = tpu.matmul %0, %2, %cst {dimension_numbers = #tpu.dot_dimension_numbers<[1], [0], [0], [1], [0, 0, 1, 1], [], []>} : vector<56x28xf32>, vector<28x144xf32>, vector<56x144xf32> -> vector<56x144xf32>
    %c55_i32 = arith.constant 55 : i32
    %4 = tpu.dynamic_rotate %0 by %c55_i32 dim 0 : vector<56x28xf32>, i32 -> vector<56x28xf32>
    %c1 = arith.constant 1 : index
    %c0_4 = arith.constant 0 : index
    %c0_5 = arith.constant 0 : index
    %5 = vector.load %arg2[%c1, %c0_4, %c0_5] : memref<5x28x144xf32, #tpu.memory_space<vmem>>, vector<1x28x144xf32>
    %6 = vector.shape_cast %5 : vector<1x28x144xf32> to vector<28x144xf32>
    %cst_6 = arith.constant dense<0.000000e+00> : vector<56x144xf32>
    %7 = tpu.matmul %4, %6, %cst_6 {dimension_numbers = #tpu.dot_dimension_numbers<[1], [0], [0], [1], [0, 0, 1, 1], [], []>} : vector<56x28xf32>, vector<28x144xf32>, vector<56x144xf32> -> vector<56x144xf32>
    %8 = arith.addf %3, %7 : vector<56x144xf32>
    %c54_i32 = arith.constant 54 : i32
    %9 = tpu.dynamic_rotate %0 by %c54_i32 dim 0 : vector<56x28xf32>, i32 -> vector<56x28xf32>
    %c2 = arith.constant 2 : index
    %c0_7 = arith.constant 0 : index
    %c0_8 = arith.constant 0 : index
    %10 = vector.load %arg2[%c2, %c0_7, %c0_8] : memref<5x28x144xf32, #tpu.memory_space<vmem>>, vector<1x28x144xf32>
    %11 = vector.shape_cast %10 : vector<1x28x144xf32> to vector<28x144xf32>
    %cst_9 = arith.constant dense<0.000000e+00> : vector<56x144xf32>
    %12 = tpu.matmul %9, %11, %cst_9 {dimension_numbers = #tpu.dot_dimension_numbers<[1], [0], [0], [1], [0, 0, 1, 1], [], []>} : vector<56x28xf32>, vector<28x144xf32>, vector<56x144xf32> -> vector<56x144xf32>
    %13 = arith.addf %8, %12 : vector<56x144xf32>
    %c53_i32 = arith.constant 53 : i32
    %14 = tpu.dynamic_rotate %0 by %c53_i32 dim 0 : vector<56x28xf32>, i32 -> vector<56x28xf32>
    %c3 = arith.constant 3 : index
    %c0_10 = arith.constant 0 : index
    %c0_11 = arith.constant 0 : index
    %15 = vector.load %arg2[%c3, %c0_10, %c0_11] : memref<5x28x144xf32, #tpu.memory_space<vmem>>, vector<1x28x144xf32>
    %16 = vector.shape_cast %15 : vector<1x28x144xf32> to vector<28x144xf32>
    %cst_12 = arith.constant dense<0.000000e+00> : vector<56x144xf32>
    %17 = tpu.matmul %14, %16, %cst_12 {dimension_numbers = #tpu.dot_dimension_numbers<[1], [0], [0], [1], [0, 0, 1, 1], [], []>} : vector<56x28xf32>, vector<28x144xf32>, vector<56x144xf32> -> vector<56x144xf32>
    %18 = arith.addf %13, %17 : vector<56x144xf32>
    %c52_i32 = arith.constant 52 : i32
    %19 = tpu.dynamic_rotate %0 by %c52_i32 dim 0 : vector<56x28xf32>, i32 -> vector<56x28xf32>
    %c4 = arith.constant 4 : index
    %c0_13 = arith.constant 0 : index
    %c0_14 = arith.constant 0 : index
    %20 = vector.load %arg2[%c4, %c0_13, %c0_14] : memref<5x28x144xf32, #tpu.memory_space<vmem>>, vector<1x28x144xf32>
    %21 = vector.shape_cast %20 : vector<1x28x144xf32> to vector<28x144xf32>
    %cst_15 = arith.constant dense<0.000000e+00> : vector<56x144xf32>
    %22 = tpu.matmul %19, %21, %cst_15 {dimension_numbers = #tpu.dot_dimension_numbers<[1], [0], [0], [1], [0, 0, 1, 1], [], []>} : vector<56x28xf32>, vector<28x144xf32>, vector<56x144xf32> -> vector<56x144xf32>
    %23 = arith.addf %18, %22 : vector<56x144xf32>
    %c0_16 = arith.constant 0 : index
    %c0_17 = arith.constant 0 : index
    %24 = vector.load %arg3[%c0_16, %c0_17] : memref<1x144xf32, #tpu.memory_space<vmem>>, vector<1x144xf32>
    %25 = vector.broadcast %24 : vector<1x144xf32> to vector<56x144xf32>
    %26 = arith.addf %23, %25 : vector<56x144xf32>
    %cst_18 = arith.constant 0.000000e+00 : f32
    %27 = vector.broadcast %cst_18 : f32 to vector<56x144xf32>
    %28 = arith.maximumf %26, %27 : vector<56x144xf32>
    %29 = vector.extract_strided_slice %28 {offsets = [0, 0], sizes = [56, 72], strides = [1, 1]} : vector<56x144xf32> to vector<56x72xf32>
    %30 = vector.extract_strided_slice %28 {offsets = [0, 72], sizes = [56, 72], strides = [1, 1]} : vector<56x144xf32> to vector<56x72xf32>
    %31 = arith.maximumf %29, %30 : vector<56x72xf32>
    %c55_i32_19 = arith.constant 55 : i32
    %32 = tpu.dynamic_rotate %31 by %c55_i32_19 dim 0 : vector<56x72xf32>, i32 -> vector<56x72xf32>
    %33 = arith.maximumf %31, %32 : vector<56x72xf32>
    %c0_20 = arith.constant 0 : index
    %c0_21 = arith.constant 0 : index
    %c0_22 = arith.constant 0 : index
    %34 = vector.load %arg4[%c0_20, %c0_21, %c0_22] : memref<5x72x128xf32, #tpu.memory_space<vmem>>, vector<1x72x128xf32>
    %35 = vector.shape_cast %34 : vector<1x72x128xf32> to vector<72x128xf32>
    %cst_23 = arith.constant dense<0.000000e+00> : vector<56x128xf32>
    %36 = tpu.matmul %33, %35, %cst_23 {dimension_numbers = #tpu.dot_dimension_numbers<[1], [0], [0], [1], [0, 0, 1, 1], [], []>} : vector<56x72xf32>, vector<72x128xf32>, vector<56x128xf32> -> vector<56x128xf32>
    %c54_i32_24 = arith.constant 54 : i32
    %37 = tpu.dynamic_rotate %33 by %c54_i32_24 dim 0 : vector<56x72xf32>, i32 -> vector<56x72xf32>
    %c1_25 = arith.constant 1 : index
    %c0_26 = arith.constant 0 : index
    %c0_27 = arith.constant 0 : index
    %38 = vector.load %arg4[%c1_25, %c0_26, %c0_27] : memref<5x72x128xf32, #tpu.memory_space<vmem>>, vector<1x72x128xf32>
    %39 = vector.shape_cast %38 : vector<1x72x128xf32> to vector<72x128xf32>
    %cst_28 = arith.constant dense<0.000000e+00> : vector<56x128xf32>
    %40 = tpu.matmul %37, %39, %cst_28 {dimension_numbers = #tpu.dot_dimension_numbers<[1], [0], [0], [1], [0, 0, 1, 1], [], []>} : vector<56x72xf32>, vector<72x128xf32>, vector<56x128xf32> -> vector<56x128xf32>
    %41 = arith.addf %36, %40 : vector<56x128xf32>
    %c52_i32_29 = arith.constant 52 : i32
    %42 = tpu.dynamic_rotate %33 by %c52_i32_29 dim 0 : vector<56x72xf32>, i32 -> vector<56x72xf32>
    %c2_30 = arith.constant 2 : index
    %c0_31 = arith.constant 0 : index
    %c0_32 = arith.constant 0 : index
    %43 = vector.load %arg4[%c2_30, %c0_31, %c0_32] : memref<5x72x128xf32, #tpu.memory_space<vmem>>, vector<1x72x128xf32>
    %44 = vector.shape_cast %43 : vector<1x72x128xf32> to vector<72x128xf32>
    %cst_33 = arith.constant dense<0.000000e+00> : vector<56x128xf32>
    %45 = tpu.matmul %42, %44, %cst_33 {dimension_numbers = #tpu.dot_dimension_numbers<[1], [0], [0], [1], [0, 0, 1, 1], [], []>} : vector<56x72xf32>, vector<72x128xf32>, vector<56x128xf32> -> vector<56x128xf32>
    %46 = arith.addf %41, %45 : vector<56x128xf32>
    %c50_i32 = arith.constant 50 : i32
    %47 = tpu.dynamic_rotate %33 by %c50_i32 dim 0 : vector<56x72xf32>, i32 -> vector<56x72xf32>
    %c3_34 = arith.constant 3 : index
    %c0_35 = arith.constant 0 : index
    %c0_36 = arith.constant 0 : index
    %48 = vector.load %arg4[%c3_34, %c0_35, %c0_36] : memref<5x72x128xf32, #tpu.memory_space<vmem>>, vector<1x72x128xf32>
    %49 = vector.shape_cast %48 : vector<1x72x128xf32> to vector<72x128xf32>
    %cst_37 = arith.constant dense<0.000000e+00> : vector<56x128xf32>
    %50 = tpu.matmul %47, %49, %cst_37 {dimension_numbers = #tpu.dot_dimension_numbers<[1], [0], [0], [1], [0, 0, 1, 1], [], []>} : vector<56x72xf32>, vector<72x128xf32>, vector<56x128xf32> -> vector<56x128xf32>
    %51 = arith.addf %46, %50 : vector<56x128xf32>
    %c48_i32 = arith.constant 48 : i32
    %52 = tpu.dynamic_rotate %33 by %c48_i32 dim 0 : vector<56x72xf32>, i32 -> vector<56x72xf32>
    %c4_38 = arith.constant 4 : index
    %c0_39 = arith.constant 0 : index
    %c0_40 = arith.constant 0 : index
    %53 = vector.load %arg4[%c4_38, %c0_39, %c0_40] : memref<5x72x128xf32, #tpu.memory_space<vmem>>, vector<1x72x128xf32>
    %54 = vector.shape_cast %53 : vector<1x72x128xf32> to vector<72x128xf32>
    %cst_41 = arith.constant dense<0.000000e+00> : vector<56x128xf32>
    %55 = tpu.matmul %52, %54, %cst_41 {dimension_numbers = #tpu.dot_dimension_numbers<[1], [0], [0], [1], [0, 0, 1, 1], [], []>} : vector<56x72xf32>, vector<72x128xf32>, vector<56x128xf32> -> vector<56x128xf32>
    %56 = arith.addf %51, %55 : vector<56x128xf32>
    %c0_42 = arith.constant 0 : index
    %c0_43 = arith.constant 0 : index
    %57 = vector.load %arg5[%c0_42, %c0_43] : memref<1x128xf32, #tpu.memory_space<vmem>>, vector<1x128xf32>
    %58 = vector.broadcast %57 : vector<1x128xf32> to vector<56x128xf32>
    %59 = arith.addf %56, %58 : vector<56x128xf32>
    %cst_44 = arith.constant 0.000000e+00 : f32
    %60 = vector.broadcast %cst_44 : f32 to vector<56x128xf32>
    %61 = arith.maximumf %59, %60 : vector<56x128xf32>
    %62 = vector.extract_strided_slice %61 {offsets = [0, 0], sizes = [56, 64], strides = [1, 1]} : vector<56x128xf32> to vector<56x64xf32>
    %63 = vector.extract_strided_slice %61 {offsets = [0, 64], sizes = [56, 64], strides = [1, 1]} : vector<56x128xf32> to vector<56x64xf32>
    %64 = arith.maximumf %62, %63 : vector<56x64xf32>
    %c54_i32_45 = arith.constant 54 : i32
    %65 = tpu.dynamic_rotate %64 by %c54_i32_45 dim 0 : vector<56x64xf32>, i32 -> vector<56x64xf32>
    %66 = arith.maximumf %64, %65 : vector<56x64xf32>
    %c0_46 = arith.constant 0 : index
    %c0_47 = arith.constant 0 : index
    %c0_48 = arith.constant 0 : index
    %67 = vector.load %arg6[%c0_46, %c0_47, %c0_48] : memref<4x2x56xf32, #tpu.memory_space<vmem>>, vector<1x2x56xf32>
    %68 = vector.shape_cast %67 : vector<1x2x56xf32> to vector<2x56xf32>
    %cst_49 = arith.constant dense<0.000000e+00> : vector<2x64xf32>
    %69 = tpu.matmul %68, %66, %cst_49 {dimension_numbers = #tpu.dot_dimension_numbers<[1], [0], [0], [1], [0, 0, 1, 1], [], []>} : vector<2x56xf32>, vector<56x64xf32>, vector<2x64xf32> -> vector<2x64xf32>
    %c1_50 = arith.constant 1 : index
    %c0_51 = arith.constant 0 : index
    %c0_52 = arith.constant 0 : index
    %70 = vector.load %arg6[%c1_50, %c0_51, %c0_52] : memref<4x2x56xf32, #tpu.memory_space<vmem>>, vector<1x2x56xf32>
    %71 = vector.shape_cast %70 : vector<1x2x56xf32> to vector<2x56xf32>
    %cst_53 = arith.constant dense<0.000000e+00> : vector<2x64xf32>
    %72 = tpu.matmul %71, %66, %cst_53 {dimension_numbers = #tpu.dot_dimension_numbers<[1], [0], [0], [1], [0, 0, 1, 1], [], []>} : vector<2x56xf32>, vector<56x64xf32>, vector<2x64xf32> -> vector<2x64xf32>
    %c2_54 = arith.constant 2 : index
    %c0_55 = arith.constant 0 : index
    %c0_56 = arith.constant 0 : index
    %73 = vector.load %arg6[%c2_54, %c0_55, %c0_56] : memref<4x2x56xf32, #tpu.memory_space<vmem>>, vector<1x2x56xf32>
    %74 = vector.shape_cast %73 : vector<1x2x56xf32> to vector<2x56xf32>
    %cst_57 = arith.constant dense<0.000000e+00> : vector<2x64xf32>
    %75 = tpu.matmul %74, %66, %cst_57 {dimension_numbers = #tpu.dot_dimension_numbers<[1], [0], [0], [1], [0, 0, 1, 1], [], []>} : vector<2x56xf32>, vector<56x64xf32>, vector<2x64xf32> -> vector<2x64xf32>
    %c3_58 = arith.constant 3 : index
    %c0_59 = arith.constant 0 : index
    %c0_60 = arith.constant 0 : index
    %76 = vector.load %arg6[%c3_58, %c0_59, %c0_60] : memref<4x2x56xf32, #tpu.memory_space<vmem>>, vector<1x2x56xf32>
    %77 = vector.shape_cast %76 : vector<1x2x56xf32> to vector<2x56xf32>
    %cst_61 = arith.constant dense<0.000000e+00> : vector<2x64xf32>
    %78 = tpu.matmul %77, %66, %cst_61 {dimension_numbers = #tpu.dot_dimension_numbers<[1], [0], [0], [1], [0, 0, 1, 1], [], []>} : vector<2x56xf32>, vector<56x64xf32>, vector<2x64xf32> -> vector<2x64xf32>
    %79 = tpu.concatenate %69, %72, %75, %78 in 1 : vector<2x64xf32>, vector<2x64xf32>, vector<2x64xf32>, vector<2x64xf32> -> vector<2x256xf32>
    %c0_62 = arith.constant 0 : index
    %c0_63 = arith.constant 0 : index
    %80 = vector.load %arg7[%c0_62, %c0_63] : memref<256x128xf32, #tpu.memory_space<vmem>>, vector<256x128xf32>
    %cst_64 = arith.constant dense<0.000000e+00> : vector<2x128xf32>
    %81 = tpu.matmul %79, %80, %cst_64 {dimension_numbers = #tpu.dot_dimension_numbers<[1], [0], [0], [1], [0, 0, 1, 1], [], []>} : vector<2x256xf32>, vector<256x128xf32>, vector<2x128xf32> -> vector<2x128xf32>
    %c0_65 = arith.constant 0 : index
    %c0_66 = arith.constant 0 : index
    %82 = vector.load %arg8[%c0_65, %c0_66] : memref<1x128xf32, #tpu.memory_space<vmem>>, vector<1x128xf32>
    %83 = vector.broadcast %82 : vector<1x128xf32> to vector<2x128xf32>
    %84 = arith.addf %81, %83 : vector<2x128xf32>
    %cst_67 = arith.constant 0.000000e+00 : f32
    %85 = vector.broadcast %cst_67 : f32 to vector<2x128xf32>
    %86 = arith.maximumf %84, %85 : vector<2x128xf32>
    %c0_68 = arith.constant 0 : index
    %c0_69 = arith.constant 0 : index
    %87 = vector.load %arg9[%c0_68, %c0_69] : memref<128x128xf32, #tpu.memory_space<vmem>>, vector<128x128xf32>
    %cst_70 = arith.constant dense<0.000000e+00> : vector<2x128xf32>
    %88 = tpu.matmul %86, %87, %cst_70 {dimension_numbers = #tpu.dot_dimension_numbers<[1], [0], [0], [1], [0, 0, 1, 1], [], []>} : vector<2x128xf32>, vector<128x128xf32>, vector<2x128xf32> -> vector<2x128xf32>
    %c0_71 = arith.constant 0 : index
    %c0_72 = arith.constant 0 : index
    %89 = vector.load %arg10[%c0_71, %c0_72] : memref<1x128xf32, #tpu.memory_space<vmem>>, vector<1x128xf32>
    %90 = vector.broadcast %89 : vector<1x128xf32> to vector<2x128xf32>
    %91 = arith.addf %88, %90 : vector<2x128xf32>
    %cst_73 = arith.constant 0.000000e+00 : f32
    %92 = vector.broadcast %cst_73 : f32 to vector<2x128xf32>
    %93 = arith.maximumf %91, %92 : vector<2x128xf32>
    %c0_74 = arith.constant 0 : index
    %c0_75 = arith.constant 0 : index
    %94 = vector.load %arg11[%c0_74, %c0_75] : memref<128x128xf32, #tpu.memory_space<vmem>>, vector<128x128xf32>
    %cst_76 = arith.constant dense<0.000000e+00> : vector<2x128xf32>
    %95 = tpu.matmul %93, %94, %cst_76 {dimension_numbers = #tpu.dot_dimension_numbers<[1], [0], [0], [1], [0, 0, 1, 1], [], []>} : vector<2x128xf32>, vector<128x128xf32>, vector<2x128xf32> -> vector<2x128xf32>
    %c0_77 = arith.constant 0 : index
    %c0_78 = arith.constant 0 : index
    %96 = vector.load %arg12[%c0_77, %c0_78] : memref<1x128xf32, #tpu.memory_space<vmem>>, vector<1x128xf32>
    %97 = vector.broadcast %96 : vector<1x128xf32> to vector<2x128xf32>
    %98 = arith.addf %95, %97 : vector<2x128xf32>
    %c0_79 = arith.constant 0 : index
    %c0_80 = arith.constant 0 : index
    %99 = vector.load %arg13[%c0_79, %c0_80] : memref<2x128xf32, #tpu.memory_space<vmem>>, vector<2x128xf32>
    tpu.vector_store %arg13[%c0_79, %c0_80], %98 {strides = array<i32>} : memref<2x128xf32, #tpu.memory_space<vmem>>, vector<2x128xf32>,
    return
  }
  func.func @transform_0(%arg0: i32) -> (i32, i32) {
    %c0_i32 = arith.constant 0 : i32
    %c0_i32_0 = arith.constant 0 : i32
    return %arg0, %c0_i32 : i32, i32
  }
  func.func @transform_1(%arg0: i32) -> (i32, i32, i32) {
    %c0_i32 = arith.constant 0 : i32
    %c0_i32_0 = arith.constant 0 : i32
    %c0_i32_1 = arith.constant 0 : i32
    %c0_i32_2 = arith.constant 0 : i32
    return %c0_i32, %c0_i32_0, %c0_i32_1 : i32, i32, i32
  }
  func.func @transform_2(%arg0: i32) -> (i32, i32) {
    %c0_i32 = arith.constant 0 : i32
    %c0_i32_0 = arith.constant 0 : i32
    %c0_i32_1 = arith.constant 0 : i32
    return %c0_i32, %c0_i32_0 : i32, i32
  }
  func.func @transform_3(%arg0: i32) -> (i32, i32, i32) {
    %c0_i32 = arith.constant 0 : i32
    %c0_i32_0 = arith.constant 0 : i32
    %c0_i32_1 = arith.constant 0 : i32
    %c0_i32_2 = arith.constant 0 : i32
    return %c0_i32, %c0_i32_0, %c0_i32_1 : i32, i32, i32
  }
  func.func @transform_4(%arg0: i32) -> (i32, i32) {
    %c0_i32 = arith.constant 0 : i32
    %c0_i32_0 = arith.constant 0 : i32
    %c0_i32_1 = arith.constant 0 : i32
    return %c0_i32, %c0_i32_0 : i32, i32
  }
  func.func @transform_5(%arg0: i32) -> (i32, i32, i32) {
    %c0_i32 = arith.constant 0 : i32
    %c0_i32_0 = arith.constant 0 : i32
    %c0_i32_1 = arith.constant 0 : i32
    %c0_i32_2 = arith.constant 0 : i32
    return %c0_i32, %c0_i32_0, %c0_i32_1 : i32, i32, i32
  }
  func.func @transform_6(%arg0: i32) -> (i32, i32) {
    %c0_i32 = arith.constant 0 : i32
    %c0_i32_0 = arith.constant 0 : i32
    %c0_i32_1 = arith.constant 0 : i32
    return %c0_i32, %c0_i32_0 : i32, i32
  }
  func.func @transform_7(%arg0: i32) -> (i32, i32) {
    %c0_i32 = arith.constant 0 : i32
    %c0_i32_0 = arith.constant 0 : i32
    %c0_i32_1 = arith.constant 0 : i32
    return %c0_i32, %c0_i32_0 : i32, i32
  }
  func.func @transform_8(%arg0: i32) -> (i32, i32) {
    %c0_i32 = arith.constant 0 : i32
    %c0_i32_0 = arith.constant 0 : i32
    %c0_i32_1 = arith.constant 0 : i32
    return %c0_i32, %c0_i32_0 : i32, i32
  }
  func.func @transform_9(%arg0: i32) -> (i32, i32) {
    %c0_i32 = arith.constant 0 : i32
    %c0_i32_0 = arith.constant 0 : i32
    %c0_i32_1 = arith.constant 0 : i32
    return %c0_i32, %c0_i32_0 : i32, i32
  }
  func.func @transform_10(%arg0: i32) -> (i32, i32) {
    %c0_i32 = arith.constant 0 : i32
    %c0_i32_0 = arith.constant 0 : i32
    %c0_i32_1 = arith.constant 0 : i32
    return %c0_i32, %c0_i32_0 : i32, i32
  }
  func.func @transform_11(%arg0: i32) -> (i32, i32) {
    %c0_i32 = arith.constant 0 : i32
    %c0_i32_0 = arith.constant 0 : i32
    %c0_i32_1 = arith.constant 0 : i32
    return %c0_i32, %c0_i32_0 : i32, i32
  }
  func.func @transform_12(%arg0: i32) -> (i32, i32) {
    %c0_i32 = arith.constant 0 : i32
    %c0_i32_0 = arith.constant 0 : i32
    return %arg0, %c0_i32 : i32, i32
  }
}

</mosaic_0001>

<bundles_post_ra>
// kernel: cnn_forward.1
= control target key start
LH: loop header
LB: loop body
LE: loop exit
PB: predicated region body
PF: predicated region fallthrough
CT: control target
= control target key end

     0   :  { %17 = vsyncpa [#allocation3], 0  ;;  %s4439_s0 = inlined_call_operand.hbm [shape: f32[56,28], index: 0, kind: input, shape index: {}]   ;;  %s4440_s1 = inlined_call_operand.hbm [shape: f32[5,28,144], index: 1, kind: input, shape index: {}]   ;;  %s4441_s2 = inlined_call_operand.vmem [shape: f32[1,144], index: 2, kind: input, shape index: {}]   ;;  %s4442_s3 = inlined_call_operand.hbm [shape: f32[5,72,128], index: 3, kind: input, shape index: {}]   ;;  %s4443_s4 = inlined_call_operand.vmem [shape: f32[1,128], index: 4, kind: input, shape index: {}]   ;;  %s4444_s5 = inlined_call_operand.vmem [shape: f32[4,2,56], index: 5, kind: input, shape index: {}]   ;;  %s4445_s6 = inlined_call_operand.hbm [shape: f32[256,128], index: 6, kind: input, shape index: {}]   ;;  %s4446_s7 = inlined_call_operand.vmem [shape: f32[1,128], index: 7, kind: input, shape index: {}]   ;;  %s4447_s8 = inlined_call_operand.hbm [shape: f32[128,128], index: 8, kind: input, shape index: {}]   ;;  %s4448_s9 = inlined_call_operand.vmem [shape: f32[1,128], index: 9, kind: input, shape index: {}]   ;;  %s4449_s10 = inlined_call_operand.hbm [shape: f32[128,128], index: 10, kind: input, shape index: {}]   ;;  %s4450_s11 = inlined_call_operand.vmem [shape: f32[1,128], index: 11, kind: input, shape index: {}]   ;;  %s4451_s12 = inlined_call_operand.hbm [shape: f32[2,128], index: 12, kind: output, shape index: {}]  }
   0x1   :  { %18 = vsyncpa [#allocation6], 0 }
   0x2   :  { %19 = vsyncpa [#allocation9], 0 }
   0x3   :  { %20 = vsyncpa [#allocation12], 0 }
   0x4   :  { %21 = vsyncpa [#allocation4], 0  ;;  %s3564_s21 = smov [#allocation5]   ;;  %s3400_s25 = scalar_lea.hbm %s4440_s1, 5120 }
   0x5   :  { %s39_s22 = sshll.u32 %s3564_s21, 4  ;;  %p3401_p0 = scmp.ne.s32.totalorder %s4440_s1, %s3400_s25  ;;  %s40_s22 = int_to_ptr.vmem [resolvable:$true] %s39_s22 }
   0x6   :  { %p3404_p1 = scmp.lt.u32.totalorder %s3400_s25, %s4440_s1 }
   0x8   :  { %p3406_p2 = pnand %p3404_p1, %p3401_p0 }
   0xa   :  { %3409 = shalt.err (!%p3406_p2)
}
   0xb   :  { %s3410_s30 = scalar_lea.vmem %s40_s22, 5120  ;;  %p3415_p4 = scmp.lt.s32.totalorder %s40_s22, %s40_s22 }
   0xc   :  { %p3411_p3 = scmp.ne.s32.totalorder %s40_s22, %s3410_s30  ;;  %p3416_p5 = scmp.lt.s32.totalorder %s3410_s30, %s3410_s30 }
   0xe   :  { %p3417_p6 = por %p3416_p5, %p3415_p4 }
  0x10   :  { %p3418_p7 = pnand %p3417_p6, %p3411_p3 }
  0x12   :  { %3421 = shalt.err (!%p3418_p7)
}
  0x13   :  { %s3565_s13 = smov 256   ;;  %s3566_s14 = smov 16  }
  0x14   :  { %45 = dma.hbm_to_vmem [thread:$0]  %s4440_s1, 5120, %s40_s22, [#allocation6], %s3565_s13, %s3565_s13, %s3566_s14  }
  0x15   :  { %s3567_s17 = smov [#allocation8]   ;;  %s3568_s19 = smov [#allocation2]  }
  0x16   :  { %s69_s18 = sshll.u32 %s3567_s17, 4  ;;  %s27_s20 = sshll.u32 %s3568_s19, 4  ;;  %s70_s18 = int_to_ptr.vmem [resolvable:$true] %s69_s18  ;;  %s28_s20 = int_to_ptr.vmem [resolvable:$true] %s27_s20 }
  0x17   :  { %s3422_s24 = scalar_lea.hbm %s4445_s6, 4096 }
  0x18   :  { %p3423_p8 = scmp.ne.s32.totalorder %s4445_s6, %s3422_s24  ;;  %p3426_p9 = scmp.lt.u32.totalorder %s3422_s24, %s4445_s6 }
  0x1a   :  { %p3428_p10 = pnand %p3426_p9, %p3423_p8 }
  0x1c   :  { %3431 = shalt.err (!%p3428_p10)
}
  0x1d   :  { %s3432_s1 = scalar_lea.vmem %s70_s18, 4096  ;;  %p3437_p12 = scmp.lt.s32.totalorder %s70_s18, %s70_s18 }
  0x1e   :  { %p3433_p11 = scmp.ne.s32.totalorder %s70_s18, %s3432_s1  ;;  %p3438_p13 = scmp.lt.s32.totalorder %s3432_s1, %s3432_s1 }
  0x20   :  { %p3439_p0 = por %p3438_p13, %p3437_p12 }
  0x22   :  { %p3440_p1 = pnand %p3439_p0, %p3433_p11 }
  0x24   :  { %3443 = shalt.err (!%p3440_p1)
}
  0x25   :  { %s3569_s22 = smov 128   ;;  %s3570_s29 = smov 8  }
  0x26   :  { %75 = dma.hbm_to_vmem [thread:$0]  %s4445_s6, 4096, %s70_s18, [#allocation9], %s3569_s22, %s3569_s22, %s3570_s29  }
  0x27   :  { %s3444_s16 = scalar_lea.hbm %s4439_s0, 896 }
  0x28   :  { %p3445_p2 = scmp.ne.s32.totalorder %s4439_s0, %s3444_s16  ;;  %p3448_p3 = scmp.lt.u32.totalorder %s3444_s16, %s4439_s0 }
  0x2a   :  { %p3450_p4 = pnand %p3448_p3, %p3445_p2 }
  0x2c   :  { %3453 = shalt.err (!%p3450_p4)
}
  0x2d   :  { %s3454_s24 = scalar_lea.vmem %s28_s20, 896  ;;  %p3459_p6 = scmp.lt.s32.totalorder %s28_s20, %s28_s20 }
  0x2e   :  { %p3455_p5 = scmp.ne.s32.totalorder %s28_s20, %s3454_s24  ;;  %p3460_p7 = scmp.lt.s32.totalorder %s3454_s24, %s3454_s24 }
  0x30   :  { %p3461_p8 = por %p3460_p7, %p3459_p6 }
  0x32   :  { %p3462_p9 = pnand %p3461_p8, %p3455_p5 }
  0x34   :  { %3465 = shalt.err (!%p3462_p9)
}
  0x35   :  { %33 = dma.hbm_to_vmem [thread:$0]  %s4439_s0, 896, %s28_s20, [#allocation3], %s3569_s22, %s3569_s22, %s3570_s29  }
  0x36   :  { %s3571_s25 = smov [#allocation7]   ;;  %s3572_s27 = smov [#allocation10]  }
  0x37   :  { %s53_s26 = sshll.u32 %s3571_s25, 4  ;;  %s83_s28 = sshll.u32 %s3572_s27, 4  ;;  %s54_s26 = int_to_ptr.vmem [resolvable:$true] %s53_s26  ;;  %s84_s28 = int_to_ptr.vmem [resolvable:$true] %s83_s28 }
  0x38   :  { %s3466_s13 = scalar_lea.hbm %s4442_s3, 5760 }
  0x39   :  { %p3467_p10 = scmp.ne.s32.totalorder %s4442_s3, %s3466_s13  ;;  %p3470_p11 = scmp.lt.u32.totalorder %s3466_s13, %s4442_s3 }
  0x3b   :  { %p3472_p12 = pnand %p3470_p11, %p3467_p10 }
  0x3d   :  { %3475 = shalt.err (!%p3472_p12)
}
  0x3e   :  { %s3476_s0 = scalar_lea.vmem %s54_s26, 5760  ;;  %p3481_p0 = scmp.lt.s32.totalorder %s54_s26, %s54_s26 }
  0x3f   :  { %p3477_p13 = scmp.ne.s32.totalorder %s54_s26, %s3476_s0  ;;  %p3482_p1 = scmp.lt.s32.totalorder %s3476_s0, %s3476_s0 }
  0x41   :  { %p3483_p2 = por %p3482_p1, %p3481_p0 }
  0x43   :  { %p3484_p3 = pnand %p3483_p2, %p3477_p13 }
  0x45   :  { %3487 = shalt.err (!%p3484_p3)
}
  0x46   :  { %59 = dma.hbm_to_vmem [thread:$0]  %s4442_s3, 5760, %s54_s26, [#allocation6], %s3569_s22, %s3569_s22, %s3570_s29  }
  0x47   :  { %s3488_s24 = scalar_lea.hbm %s4447_s8, 2048 }
  0x48   :  { %p3489_p4 = scmp.ne.s32.totalorder %s4447_s8, %s3488_s24  ;;  %p3492_p5 = scmp.lt.u32.totalorder %s3488_s24, %s4447_s8 }
  0x4a   :  { %p3494_p6 = pnand %p3492_p5, %p3489_p4 }
  0x4c   :  { %3497 = shalt.err (!%p3494_p6)
}
  0x4d   :  { %s3498_s1 = scalar_lea.vmem %s84_s28, 2048  ;;  %p3503_p8 = scmp.lt.s32.totalorder %s84_s28, %s84_s28 }
  0x4e   :  { %p3499_p7 = scmp.ne.s32.totalorder %s84_s28, %s3498_s1  ;;  %p3504_p9 = scmp.lt.s32.totalorder %s3498_s1, %s3498_s1 }
  0x50   :  { %p3505_p10 = por %p3504_p9, %p3503_p8 }
  0x52   :  { %p3506_p11 = pnand %p3505_p10, %p3499_p7 }
  0x54   :  { %3509 = shalt.err (!%p3506_p11)
}
  0x55   :  { %89 = dma.hbm_to_vmem [thread:$0]  %s4447_s8, 2048, %s84_s28, [#allocation9], %s3569_s22, %s3569_s22, %s3570_s29  }
  0x56   :  { %s3573_s30 = smov [#allocation11]   ;;  %s3510_s16 = scalar_lea.hbm %s4449_s10, 2048 }
  0x57   :  { %s97_s13 = sshll.u32 %s3573_s30, 4  ;;  %p3511_p12 = scmp.ne.s32.totalorder %s4449_s10, %s3510_s16  ;;  %s98_s13 = int_to_ptr.vmem [resolvable:$true] %s97_s13 }
  0x58   :  { %p3514_p13 = scmp.lt.u32.totalorder %s3510_s16, %s4449_s10 }
  0x5a   :  { %p3516_p0 = pnand %p3514_p13, %p3511_p12 }
  0x5c   :  { %3519 = shalt.err (!%p3516_p0)
}
  0x5d   :  { %s3520_s21 = scalar_lea.vmem %s98_s13, 2048  ;;  %p3525_p2 = scmp.lt.s32.totalorder %s98_s13, %s98_s13 }
  0x5e   :  { %p3521_p1 = scmp.ne.s32.totalorder %s98_s13, %s3520_s21  ;;  %p3526_p3 = scmp.lt.s32.totalorder %s3520_s21, %s3520_s21 }
  0x60   :  { %p3527_p4 = por %p3526_p3, %p3525_p2 }
  0x62   :  { %p3528_p5 = pnand %p3527_p4, %p3521_p1 }
  0x64   :  { %3531 = shalt.err (!%p3528_p5)
}
  0x65   :  { %103 = dma.hbm_to_vmem [thread:$0]  %s4449_s10, 2048, %s98_s13, [#allocation12], %s3569_s22, %s3569_s22, %s3570_s29  }
  0x66   :  { %3554 = dma.done.wait [#allocation3], 896  }
  0x67   :  { %3555 = vsyncadd [#allocation3], 4294966400 }
  0x68   :  { %3556 = dma.done.wait [#allocation6], 10880  }
  0x69   :  { %3557 = vsyncadd [#allocation6], 4294956416 }
  0x6a   :  { %3558 = dma.done.wait [#allocation9], 6144  }
  0x6b   :  { %3559 = vsyncadd [#allocation9], 4294961152 }
  0x6c   :  { %3560 = dma.done.wait [#allocation12], 2048  }
  0x6d   :  { %3561 = vsyncadd [#allocation12], 4294965248  ;;  %v3574_v0 = vmov 0.0   ;;  %vm187_vm0 = vcmask 1043456   ;;  %v146_v1 = vlaneseq  ;;  %vm3575_vm1 = vmmov 1   ;;  %v158_v3 = vld [vmem:[#allocation5 + $0x48] sm:$0xff] }
  0x6e   :  { %258 = vmatprep.mubr.f32.mxu0 %v3574_v0  ;;  %270 = vmatprep.mubr.f32.mxu1 %v3574_v0  ;;  %vm3735_vm2 = vmpackc.low %vm187_vm0, %vm3575_vm1  ;;  %v160_v4 = vld [vmem:[#allocation5 + $0x58] sm:$0xff]  ;;  %v157_v5 = vld [vmem:[#allocation5 + $0x40] sm:$0xff]  ;;  %vm165_vm5 = vcmask 228352   ;;  %vm3578_vm8 = vmmov 0   ;;  %vm1033_vm9 = vcmask 457728   ;;  %vm1109_vm10 = vcmask 588800  }
  0x6f   :  { %v3082_v6 = vpack.c.bf16 %v160_v4, %v158_v3  ;;  %v159_v7 = vld [vmem:[#allocation5 + $0x50] sm:$0xff]  ;;  %v162_v8 = vld [vmem:[#allocation5 + $0x68] sm:$0xff]  ;;  %v164_v9 = vld [vmem:[#allocation5 + $0x78] sm:$0xf]  ;;  %v3739_v10 = vshrl.u32 %v146_v1, 7  ;;  %s3579_s24 = smov 64  }
  0x70   :  { %v3084_v11 = vpack.c.bf16 %v159_v7, %v157_v5  ;;  %v3086_v12 = vpack.c.bf16 %v164_v9, %v162_v8  ;;  %v161_v13 = vld [vmem:[#allocation5 + $0x60] sm:$0xff]  ;;  %v163_v14 = vld [vmem:[#allocation5 + $0x70] sm:$0xf]  ;;  %v3741_v15 = vld [vmem:[#allocation2] sm:$0xff]  ;;  %vm2158_vm12 = vcmask 523264   ;;  %s3580_s16 = smov [#allocation13]  }
  0x71   :  { %3083 = vmatprep.subr.bf16.mxu0 %v3082_v6  ;;  %v3743_v16 = vld [vmem:[#allocation2 + $0x8] sm:$0xff]  ;;  %v132_v17 = vld [vmem:[#allocation5 + $0x8] sm:$0xff]  ;;  %v134_v18 = vld [vmem:[#allocation5 + $0x18] sm:$0xff]  ;;  %v607_v19 = vrot.slane %v3741_v15, 3  ;;  %vm614_vm3 = vcmp.lt.s32.totalorder %v3739_v10, 5  ;;  %3308 = vmatprep.subr.bf16.mxu1 %v3082_v6  ;;  %v3089_v20 = vpack.c.bf16 %v163_v14, %v161_v13  ;;  %v139_v21 = vrot.slane %v3741_v15, 1 }
  0x72   :  { %3085 = vmatpush1.bf16.msra.mxu0 %v3084_v11  ;;  %v140_v22 = vrot.slane %v3743_v16, 1  ;;  %v608_v23 = vrot.slane %v3743_v16, 3  ;;  %3310 = vmatpush1.bf16.msra.mxu1 %v3084_v11  ;;  %vm148_vm4 = vcmp.lt.s32.totalorder %v3739_v10, 7  ;;  %v3092_v24 = vpack.c.bf16 %v134_v18, %v132_v17  ;;  %v131_v25 = vld [vmem:[#allocation5] sm:$0xff]  ;;  %v133_v26 = vld [vmem:[#allocation5 + $0x10] sm:$0xff]  ;;  %v3753_v27 = vld [vmem:[#allocation2 + $0x10] sm:$0xff] }
  0x73   :  { %3088 = vmatprep.subr.msk.bf16.mxu0 %vm3735_vm2, %v3086_v12  ;;  %3309 = vmatprep.subr.msk.bf16.mxu1 %vm3735_vm2, %v3086_v12  ;;  %v136_v28 = vld [vmem:[#allocation5 + $0x28] sm:$0xff]  ;;  %v138_v29 = vld [vmem:[#allocation5 + $0x38] sm:$0xf]  ;;  %v3094_v32 = vpack.c.bf16 %v133_v26, %v131_v25  ;;  %v141_v33 = vrot.slane %v3753_v27, 1  ;;  %v609_v34 = vrot.slane %v3753_v27, 3  ;;  %v135_v36 = vld [vmem:[#allocation5 + $0x20] sm:$0xff] }
  0x74   :  { %v3761_v30 = vsel %vm614_vm3, %v607_v19, %v608_v23  ;;  %v154_v31 = vsel %vm148_vm4, %v139_v21, %v140_v22  ;;  %v3096_v35 = vpack.c.bf16 %v138_v29, %v136_v28  ;;  %v137_v37 = vld [vmem:[#allocation5 + $0x30] sm:$0xf]  ;;  %v452_v38 = vld [vmem:[#allocation5 + $0x88] sm:$0xff]  ;;  %v454_v39 = vld [vmem:[#allocation5 + $0x98] sm:$0xff]  ;;  %v779_v48 = vrot.slane %v3741_v15, 4  ;;  %s2465_s17 = sshll.u32 %s3580_s16, 4  ;;  %s2466_s17 = int_to_ptr.vmem [resolvable:$true] %s2465_s17 }
  0x75   :  { %v3777_v40 = vsel %vm614_vm3, %v608_v23, %v609_v34  ;;  %v153_v41 = vsel %vm148_vm4, %v140_v22, %v141_v33  ;;  %v3099_v42 = vpack.c.bf16 %v137_v37, %v135_v36  ;;  %v3102_v43 = vpack.c.bf16 %v454_v39, %v452_v38  ;;  %v451_v44 = vld [vmem:[#allocation5 + $0x80] sm:$0xff]  ;;  %v453_v45 = vld [vmem:[#allocation5 + $0x90] sm:$0xff]  ;;  %v456_v46 = vld [vmem:[#allocation5 + $0xa8] sm:$0xff]  ;;  %s3532_s0 = scalar_lea.vmem %s2466_s17, 32  ;;  %p3537_p7 = scmp.lt.s32.totalorder %s2466_s17, %s2466_s17 }
  0x76   :  { %3091 = vmatpush1.bf16.msk.msra.mxu0 %vm3735_vm2, %v3089_v20  ;;  %3311 = vmatpush1.bf16.msk.msra.mxu1 %vm3735_vm2, %v3089_v20  ;;  %v458_v47 = vld [vmem:[#allocation5 + $0xb8] sm:$0xf]  ;;  %vm786_vm6 = vcmp.lt.s32.totalorder %v3739_v10, 4  ;;  %v780_v49 = vrot.slane %v3743_v16, 4  ;;  %v3104_v50 = vpack.c.bf16 %v453_v45, %v451_v44  ;;  %v3792_v51 = vld [vmem:[#allocation2 + $0x18] sm:$0xff]  ;;  %v3794_v52 = vld [vmem:[#allocation2 + $0x20] sm:$0xff]  ;;  %p3533_p6 = scmp.ne.s32.totalorder %s2466_s17, %s3532_s0  ;;  %p3538_p8 = scmp.lt.s32.totalorder %s3532_s0, %s3532_s0 }
  0x77   :  { %3093 = vmatprep.subr.bf16.mxu0 %v3092_v24  ;;  %v781_v53 = vrot.slane %v3753_v27, 4  ;;  %v3797_v54 = vld [vmem:[#allocation2 + $0x28] sm:$0xff]  ;;  %v3106_v55 = vpack.c.bf16 %v458_v47, %v456_v46  ;;  %v455_v56 = vld [vmem:[#allocation5 + $0xa0] sm:$0xff]  ;;  %v142_v59 = vrot.slane %v3792_v51, 1  ;;  %v782_v60 = vrot.slane %v3792_v51, 4  ;;  %v624_v61 = vld [vmem:[#allocation5 + $0xc8] sm:$0xff] }
  0x78   :  { %v457_v57 = vld [vmem:[#allocation5 + $0xb0] sm:$0xf]  ;;  %v3801_v58 = vsel %vm786_vm6, %v779_v48, %v780_v49  ;;  %v626_v62 = vld [vmem:[#allocation5 + $0xd8] sm:$0xff]  ;;  %v143_v1 = vrot.slane %v3794_v52, 1  ;;  %v783_v3 = vrot.slane %v3794_v52, 4  ;;  %v784_v4 = vrot.slane %v3797_v54, 4  ;;  %p3539_p9 = por %p3538_p8, %p3537_p7 }
  0x79   :  { %2479 = vmatmul.mubr.msk.f32.vlgmr.msra.gmra.mrb[0].mxu0 %vm165_vm5, %v154_v31  ;;  %v3807_v63 = vsel %vm786_vm6, %v780_v49, %v781_v53  ;;  %v3814_v5 = vld [vmem:[#allocation2 + $0x30] sm:$0xff]  ;;  %v152_v6 = vsel %vm148_vm4, %v141_v33, %v142_v59  ;;  %v3820_v7 = vsel %vm786_vm6, %v781_v53, %v782_v60  ;;  %v3109_v8 = vpack.c.bf16 %v457_v57, %v455_v56  ;;  %v623_v29 = vld [vmem:[#allocation5 + $0xc0] sm:$0xff]  ;;  %v628_v31 = vld [vmem:[#allocation5 + $0xe8] sm:$0xff] }
  0x7a   :  { %3095 = vmatpush1.bf16.msra.mxu0 %v3094_v32  ;;  %264 = vmatprep.mubr.f32.mxu0 %v3574_v0  ;;  %v3825_v9 = vsel %vm786_vm6, %v782_v60, %v783_v3  ;;  %v3829_v11 = vsel %vm786_vm6, %v783_v3, %v784_v4  ;;  %v785_v12 = vrot.slane %v3814_v5, 4  ;;  %v3112_v13 = vpack.c.bf16 %v626_v62, %v624_v61  ;;  %v630_v32 = vld [vmem:[#allocation5 + $0xf8] sm:$0xf]  ;;  %v627_v38 = vld [vmem:[#allocation5 + $0xe0] sm:$0xff]  ;;  %v796_v39 = vld [vmem:[#allocation5 + $0x108] sm:$0xff]  ;;  %p3540_p10 = pnand %p3539_p9, %p3533_p6 }
  0x7b   :  { %3098 = vmatprep.subr.msk.bf16.mxu0 %vm3735_vm2, %v3096_v35  ;;  %2481 = vmatmul.mubr.msk.f32.vlgmr.msra.gmra.mrb[0].mxu1 %vm165_vm5, %v152_v6  ;;  %v151_v14 = vsel %vm148_vm4, %v142_v59, %v143_v1  ;;  %v144_v17 = vrot.slane %v3797_v54, 1  ;;  %v145_v23 = vrot.slane %v3814_v5, 1  ;;  %v435_v26 = vrot.slane %v3741_v15, 2  ;;  %v795_v57 = vld [vmem:[#allocation5 + $0x100] sm:$0xff]  ;;  %v797_v59 = vld [vmem:[#allocation5 + $0x110] sm:$0xff]  ;;  %v800_v60 = vld [vmem:[#allocation5 + $0x128] sm:$0xff] }
  0x7c   :  { %276 = vmatprep.mubr.f32.mxu1 %v3574_v0  ;;  %v3841_v18 = vsel %vm786_vm6, %v784_v4, %v785_v12  ;;  %v3845_v20 = vsel %vm786_vm6, %v785_v12, %v779_v48  ;;  %v436_v28 = vrot.slane %v3743_v16, 2  ;;  %vm442_vm7 = vcmp.lt.s32.totalorder %v3739_v10, 6  ;;  %v802_v61 = vld [vmem:[#allocation5 + $0x138] sm:$0xf]  ;;  %v799_v3 = vld [vmem:[#allocation5 + $0x120] sm:$0xff] }
  0x7d   :  { %2480 = vmatmul.mubr.msk.f32.gmra.mrb[2].mxu0 %vm165_vm5, %v153_v41  ;;  %v150_v22 = vsel %vm148_vm4, %v143_v1, %v144_v17  ;;  %v149_v24 = vsel %vm148_vm4, %v144_v17, %v145_v23  ;;  %v155_v25 = vsel %vm148_vm4, %v145_v23, %v139_v21  ;;  %v625_v21 = vld [vmem:[#allocation5 + $0xd0] sm:$0xff]  ;;  %v437_v35 = vrot.slane %v3753_v27, 2  ;;  %v798_v41 = vld [vmem:[#allocation5 + $0x118] sm:$0xff]  ;;  %v951_v17 = vld [vmem:[%s4441_s2] sm:$0x3]  ;;  %s3577_s2 = smov 56  }
  0x7e   :  { %3101 = vmatpush1.bf16.msk.msra.mxu0 %vm3735_vm2, %v3099_v42  ;;  %392 = vmatprep.mubr.f32.mxu0 %v3574_v0  ;;  %v448_v33 = vsel %vm442_vm7, %v435_v26, %v436_v28  ;;  %v3114_v36 = vpack.c.bf16 %v625_v21, %v623_v29  ;;  %v3116_v37 = vpack.c.bf16 %v630_v32, %v628_v31  ;;  %v439_v47 = vrot.slane %v3794_v52, 2  ;;  %v801_v4 = vld [vmem:[#allocation5 + $0x130] sm:$0xf]  ;;  %v1103_v29 = vld [vmem:[#allocation7 + $0x60] sm:$0xff] }
  0x7f   :  { %3103 = vmatprep.subr.bf16.mxu0 %v3102_v43  ;;  %2482 = vmatmul.mubr.msk.f32.gmra.mrb[2].mxu1 %vm165_vm5, %v151_v14  ;;  %v447_v42 = vsel %vm442_vm7, %v436_v28, %v437_v35  ;;  %v438_v43 = vrot.slane %v3792_v51, 2  ;;  %v3122_v45 = vpack.c.bf16 %v798_v41, %v796_v39  ;;  %v440_v49 = vrot.slane %v3797_v54, 2  ;;  %v1102_v28 = vld [vmem:[#allocation7 + $0x58] sm:$0xff] }
  0x80   :  { %282 = vmatprep.mubr.f32.mxu1 %v3574_v0  ;;  %v441_v53 = vrot.slane %v3814_v5, 2  ;;  %v3124_v62 = vpack.c.bf16 %v797_v59, %v795_v57  ;;  %v3126_v1 = vpack.c.bf16 %v802_v61, %v800_v60  ;;  %v610_v6 = vrot.slane %v3792_v51, 3 }
  0x81   :  { %2488 = vmatmul.mubr.msk.f32.vlgmr.msra.gmra.mrb[0].mxu0 %vm165_vm5, %v3741_v15  ;;  %v446_v46 = vsel %vm442_vm7, %v437_v35, %v438_v43  ;;  %v445_v48 = vsel %vm442_vm7, %v438_v43, %v439_v47  ;;  %v955_v14 = vsub.s32 0, %v3739_v10  ;;  %v3136_v31 = vpack.c.bf16 %v1103_v29, %v1102_v28 }
  0x82   :  { %398 = vmatprep.mubr.f32.mxu0 %v3574_v0  ;;  %3105 = vmatpush1.bf16.msra.mxu0 %v3104_v50  ;;  %v444_v50 = vsel %vm442_vm7, %v439_v47, %v440_v49  ;;  %v449_v56 = vsel %vm442_vm7, %v441_v53, %v435_v26  ;;  %v618_v12 = vsel %vm614_vm3, %v609_v34, %v610_v6  ;;  %v613_v34 = vrot.slane %v3814_v5, 3  ;;  %v1107_v47 = vld [vmem:[#allocation7 + $0x80] sm:$0xff] }
  0x83   :  { %3108 = vmatprep.subr.msk.bf16.mxu0 %vm3735_vm2, %v3106_v55  ;;  %2483 = vmatmul.mubr.msk.f32.gmra.mrb[4].mxu1 %vm165_vm5, %v150_v22  ;;  %v443_v55 = vsel %vm442_vm7, %v440_v49, %v441_v53  ;;  %v1101_v22 = vld [vmem:[#allocation7 + $0x50] sm:$0xff]  ;;  %vm1511_vm11 = vcmp.lt.s32.totalorder %v3739_v10, 2 }
  0x84   :  { %288 = vmatprep.mubr.f32.mxu1 %v3574_v0 }
  0x85   :  { %2489 = vmatmul.mubr.msk.f32.gmra.mrb[2].mxu0 %vm165_vm5, %v3743_v16  ;;  %v629_v16 = vld [vmem:[#allocation5 + $0xf0] sm:$0xf] }
  0x86   :  { %404 = vmatprep.mubr.f32.mxu0 %v3574_v0  ;;  %3111 = vmatpush1.bf16.msk.msra.mxu0 %vm3735_vm2, %v3109_v8  ;;  %v3119_v44 = vpack.c.bf16 %v629_v16, %v627_v38  ;;  %v3129_v8 = vpack.c.bf16 %v801_v4, %v799_v3  ;;  %v1105_v38 = vld [vmem:[#allocation7 + $0x70] sm:$0xff]  ;;  %v1108_v3 = vld [vmem:[#allocation7 + $0x88] sm:$0xff] }
  0x87   :  { %3113 = vmatprep.subr.bf16.mxu0 %v3112_v13  ;;  %2484 = vmatmul.mubr.msk.f32.gmra.mrb[6].mxu1 %vm165_vm5, %v149_v24  ;;  %v4000_v24 = vrot.slane %v951_v17, %v955_v14 }
  0x88   :  { %294 = vmatprep.mubr.f32.mxu1 %v3574_v0 }
  0x89   :  { %2490 = vmatmul.mubr.msk.f32.gmra.mrb[4].mxu0 %vm165_vm5, %v3753_v27 }
  0x8a   :  { %410 = vmatprep.mubr.f32.mxu0 %v3574_v0 }
  0x8b   :  { %2485 = vmatmul.mubr.msk.f32.gmra.mrb[8].mxu1 %vm165_vm5, %v155_v25  ;;  %v3576_v25 = vmov 0.0|0.0  }
  0x8c   :  { %3132 = vmatprep.subr.bf16.mxu1 %v3576_v25  ;;  %2767 = vmatprep.mubr.msk.f32.mxu1 %vm3578_vm8, %v3574_v0 }
  0x8d   :  { %2491 = vmatmul.mubr.msk.f32.gmra.mrb[6].mxu0 %vm165_vm5, %v3792_v51 }
  0x8e   :  { %416 = vmatprep.mubr.f32.mxu0 %v3574_v0 }
  0x91   :  { %2492 = vmatmul.mubr.msk.f32.gmra.mrb[8].mxu0 %vm165_vm5, %v3794_v52 }
  0x92   :  { %422 = vmatprep.mubr.f32.mxu0 %v3574_v0 }
  0x95   :  { %2493 = vmatmul.mubr.msk.f32.gmra.mrb[10].mxu0 %vm165_vm5, %v3797_v54 }
  0x96   :  { %428 = vmatprep.mubr.f32.mxu0 %v3574_v0 }
  0x99   :  { %2494 = vmatmul.mubr.msk.f32.gmra.mrb[12].mxu0 %vm165_vm5, %v3814_v5 }
  0x9a   :  { %550 = vmatprep.mubr.f32.mxu0 %v3574_v0 }
  0x9d   :  { %2497 = vmatmul.mubr.msk.f32.vlgmr.msra.gmra.mrb[0].mxu0 %vm165_vm5, %v448_v33 }
  0x9e   :  { %556 = vmatprep.mubr.f32.mxu0 %v3574_v0  ;;  %3115 = vmatpush1.bf16.msra.mxu0 %v3114_v36 }
  0x9f   :  { %3118 = vmatprep.subr.msk.bf16.mxu0 %vm3735_vm2, %v3116_v37  ;;  %v1104_v37 = vld [vmem:[#allocation7 + $0x68] sm:$0xff] }
  0xa0   :  { %v3139_v39 = vpack.c.bf16 %v1105_v38, %v1104_v37 }
  0xa1   :  { %2498 = vmatmul.mubr.msk.f32.gmra.mrb[2].mxu0 %vm165_vm5, %v447_v42 }
  0xa2   :  { %562 = vmatprep.mubr.f32.mxu0 %v3574_v0  ;;  %3121 = vmatpush1.bf16.msk.msra.mxu0 %vm3735_vm2, %v3119_v44 }
  0xa3   :  { %3123 = vmatprep.subr.bf16.mxu0 %v3122_v45 }
  0xa5   :  { %2499 = vmatmul.mubr.msk.f32.gmra.mrb[4].mxu0 %vm165_vm5, %v446_v46  ;;  %v1106_v46 = vld [vmem:[#allocation7 + $0x78] sm:$0xff] }
  0xa6   :  { %568 = vmatprep.mubr.f32.mxu0 %v3574_v0  ;;  %v3142_v49 = vpack.c.bf16 %v1107_v47, %v1106_v46 }
  0xa9   :  { %2500 = vmatmul.mubr.msk.f32.gmra.mrb[6].mxu0 %vm165_vm5, %v445_v48 }
  0xaa   :  { %574 = vmatprep.mubr.f32.mxu0 %v3574_v0 }
  0xad   :  { %2501 = vmatmul.mubr.msk.f32.gmra.mrb[8].mxu0 %vm165_vm5, %v444_v50 }
  0xae   :  { %580 = vmatprep.mubr.f32.mxu0 %v3574_v0 }
  0xb1   :  { %2502 = vmatmul.mubr.msk.f32.gmra.mrb[10].mxu0 %vm165_vm5, %v443_v55 }
  0xb2   :  { %586 = vmatprep.mubr.f32.mxu0 %v3574_v0 }
  0xb5   :  { %2503 = vmatmul.mubr.msk.f32.gmra.mrb[12].mxu0 %vm165_vm5, %v449_v56 }
  0xb6   :  { %722 = vmatprep.mubr.f32.mxu0 %v3574_v0 }
  0xb9   :  { %2506 = vmatmul.mubr.msk.f32.vlgmr.msra.gmra.mrb[0].mxu0 %vm165_vm5, %v3761_v30  ;;  %v611_v30 = vrot.slane %v3794_v52, 3  ;;  %v621_v52 = vsel %vm614_vm3, %v613_v34, %v607_v19 }
  0xba   :  { %728 = vmatprep.mubr.f32.mxu0 %v3574_v0  ;;  %3125 = vmatpush1.bf16.msra.mxu0 %v3124_v62 }
  0xbb   :  { %3128 = vmatprep.subr.msk.bf16.mxu0 %vm3735_vm2, %v3126_v1  ;;  %v617_v51 = vsel %vm614_vm3, %v610_v6, %v611_v30 }
  0xbd   :  { %2507 = vmatmul.mubr.msk.f32.gmra.mrb[2].mxu0 %vm165_vm5, %v3777_v40  ;;  %v612_v40 = vrot.slane %v3797_v54, 3 }
  0xbe   :  { %734 = vmatprep.mubr.f32.mxu0 %v3574_v0  ;;  %3131 = vmatpush1.bf16.msk.msra.mxu0 %vm3735_vm2, %v3129_v8 }
  0xbf   :  { %v616_v27 = vsel %vm614_vm3, %v611_v30, %v612_v40  ;;  %v615_v2 = vsel %vm614_vm3, %v612_v40, %v613_v34  ;;  %3192 = vmatprep.subr.bf16.mxu0 %v3576_v25 }
  0xc1   :  { %2508 = vmatmul.mubr.msk.f32.gmra.mrb[4].mxu0 %vm165_vm5, %v618_v12 }
  0xc2   :  { %740 = vmatprep.mubr.f32.mxu0 %v3574_v0 }
  0xc5   :  { %2509 = vmatmul.mubr.msk.f32.gmra.mrb[6].mxu0 %vm165_vm5, %v617_v51 }
  0xc6   :  { %746 = vmatprep.mubr.f32.mxu0 %v3574_v0 }
  0xc9   :  { %2510 = vmatmul.mubr.msk.f32.gmra.mrb[8].mxu0 %vm165_vm5, %v616_v27 }
  0xca   :  { %752 = vmatprep.mubr.f32.mxu0 %v3574_v0 }
  0xcd   :  { %2511 = vmatmul.mubr.msk.f32.gmra.mrb[10].mxu0 %vm165_vm5, %v615_v2 }
  0xce   :  { %758 = vmatprep.mubr.f32.mxu0 %v3574_v0 }
  0xd1   :  { %2512 = vmatmul.mubr.msk.f32.gmra.mrb[12].mxu0 %vm165_vm5, %v621_v52 }
  0xd2   :  { %894 = vmatprep.mubr.f32.mxu0 %v3574_v0 }
  0xd5   :  { %2515 = vmatmul.mubr.msk.f32.vlgmr.msra.gmra.mrb[0].mxu0 %vm165_vm5, %v3801_v58 }
  0xd6   :  { %900 = vmatprep.mubr.f32.mxu0 %v3574_v0 }
  0xd9   :  { %2516 = vmatmul.mubr.msk.f32.gmra.mrb[2].mxu0 %vm165_vm5, %v3807_v63 }
  0xda   :  { %906 = vmatprep.mubr.f32.mxu0 %v3574_v0 }
  0xdd   :  { %2517 = vmatmul.mubr.msk.f32.gmra.mrb[4].mxu0 %vm165_vm5, %v3820_v7 }
  0xde   :  { %912 = vmatprep.mubr.f32.mxu0 %v3574_v0 }
  0xe1   :  { %2518 = vmatmul.mubr.msk.f32.gmra.mrb[6].mxu0 %vm165_vm5, %v3825_v9 }
  0xe2   :  { %918 = vmatprep.mubr.f32.mxu0 %v3574_v0 }
  0xe5   :  { %2519 = vmatmul.mubr.msk.f32.gmra.mrb[8].mxu0 %vm165_vm5, %v3829_v11 }
  0xe6   :  { %924 = vmatprep.mubr.f32.mxu0 %v3574_v0 }
  0xe9   :  { %2520 = vmatmul.mubr.msk.f32.gmra.mrb[10].mxu0 %vm165_vm5, %v3841_v18  ;;  %v959_v18 = vsub.s32 1, %v3739_v10  ;;  %v2563_v10 = vld [vmem:[%s4444_s5 + $0x6] sm:$0x3] }
  0xea   :  { %930 = vmatprep.mubr.f32.mxu0 %v3574_v0 }
  0xeb   :  { %v4004_v26 = vrot.slane %v951_v17, %v959_v18 }
  0xed   :  { %2521 = vmatmul.mubr.msk.f32.gmra.mrb[12].mxu0 %vm165_vm5, %v3845_v20  ;;  %v1100_v20 = vld [vmem:[#allocation7 + $0x48] sm:$0xff] }
  0xee   :  { %v3133_v23 = vpack.c.bf16 %v1101_v22, %v1100_v20  ;;  %2958 = vmatprep.mubr.msk.f32.mxu0 %vm3578_vm8, %v3574_v0 }
  0xf0   :  { %3134 = vmatpush3.bf16.msra.mxu1 %v3133_v23 }
  0xf1   :  { %3135 = vmatprep.subr.bf16.mxu1 %v3576_v25 }
  0xf4   :  { %3137 = vmatpush3.bf16.msra.mxu1 %v3136_v31 }
  0xf5   :  { %3138 = vmatprep.subr.bf16.mxu1 %v3576_v25 }
  0xf8   :  { %3140 = vmatpush3.bf16.msra.mxu1 %v3139_v39 }
  0xf9   :  { %3141 = vmatprep.subr.bf16.mxu1 %v3576_v25 }
  0xfc   :  { %3143 = vmatpush3.bf16.msra.mxu1 %v3142_v49 }
  0xfd   :  { %2765 = vmatprep.subr.mxu1 %v3574_v0 }
 0x100   :  { %2766 = vmatpush3.msra.mxu1 %v1108_v3 }
 0x101   :  { %3144 = vmatprep.subr.bf16.mxu1 %v3576_v25 }
 0x14e   :  { %v272_v15 = vpop.f32.mrb[0].mxu1 }
 0x14f   :  { %v274_v19 = vpop.f32.mrb[1].mxu1 }
 0x152   :  { %v278_v54 = vpop.f32.mrb[2].mxu1 }
 0x153   :  { %v3981_v58 = vpop.f32.mrb[3].mxu1 }
 0x156   :  { %v3983_v63 = vpop.f32.mrb[4].mxu1 }
 0x157   :  { %v3985_v5 = vpop.f32.mrb[5].mxu1 }
 0x15a   :  { %v3987_v7 = vpop.f32.mrb[6].mxu1 }
 0x15b   :  { %v3989_v9 = vpop.f32.mrb[7].mxu1 }
 0x15e   :  { %v3991_v11 = vpop.f32.mrb[8].mxu1 }
 0x15f   :  { %v3993_v13 = vpop.f32.mrb[9].mxu1 }
 0x1a8   :  { %v896_v21 = vpop.f32.mrb[0].mxu0 }
 0x1a9   :  { %v4008_v32 = vadd.f32 %v4000_v24, %v896_v21  ;;  %v898_v33 = vpop.f32.mrb[1].mxu0 }
 0x1aa   :  { %v964_v36 = vadd.f32 %v4004_v26, %v898_v33 }
 0x1ab   :  { %v977_v35 = vmax.f32 %v4008_v32, 0.0 }
 0x1ac   :  { %v902_v16 = vpop.f32.mrb[2].mxu0  ;;  %v978_v43 = vmax.f32 %v964_v36, 0.0 }
 0x1ad   :  { %v4014_v41 = vadd.f32 %v4000_v24, %v902_v16  ;;  %1005 = vrot.lane.b32.xlu0 %v977_v35, %s3577_s2  ;;  %v904_v42 = vpop.f32.mrb[3].mxu0 }
 0x1ae   :  { %v966_v45 = vadd.f32 %v4004_v26, %v904_v42 }
 0x1af   :  { %v979_v44 = vmax.f32 %v4014_v41, 0.0 }
 0x1b0   :  { %v908_v48 = vpop.f32.mrb[4].mxu0  ;;  %v980_v56 = vmax.f32 %v966_v45, 0.0 }
 0x1b1   :  { %v3312_v50 = vadd.f32 %v908_v48, %v272_v15  ;;  %1007 = vrot.lane.b32.xlu0 %v978_v43, %s3577_s2  ;;  %1009 = vrot.lane.b32.xlu1 %v979_v44, %s3577_s2  ;;  %v910_v53 = vpop.f32.mrb[5].mxu0 }
 0x1b2   :  { %v3313_v55 = vadd.f32 %v910_v53, %v274_v19 }
 0x1b3   :  { %v4027_v57 = vadd.f32 %v3312_v50, %v4000_v24 }
 0x1b4   :  { %v968_v59 = vadd.f32 %v3313_v55, %v4004_v26  ;;  %v914_v60 = vpop.f32.mrb[6].mxu0 }
 0x1b5   :  { %v981_v61 = vmax.f32 %v4027_v57, 0.0  ;;  %v3314_v62 = vadd.f32 %v914_v60, %v278_v54  ;;  %1011 = vrot.lane.b32.xlu1 %v980_v56, %s3577_s2  ;;  %v916_v1 = vpop.f32.mrb[7].mxu0  ;;  %v1076_v56 = vld [vmem:[#allocation7] sm:$0xff] }
 0x1b6   :  { %v982_v4 = vmax.f32 %v968_v59, 0.0  ;;  %v3315_v6 = vadd.f32 %v916_v1, %v3981_v58  ;;  %v1077_v59 = vld [vmem:[#allocation7 + $0x8] sm:$0xff] }
 0x1b7   :  { %v4037_v8 = vadd.f32 %v3314_v62, %v4000_v24  ;;  %1013 = vrot.lane.b32.xlu0 %v981_v61, %s3577_s2 }
 0x1b8   :  { %v970_v12 = vadd.f32 %v3315_v6, %v4004_v26  ;;  %v920_v30 = vpop.f32.mrb[8].mxu0 }
 0x1b9   :  { %v983_v51 = vmax.f32 %v4037_v8, 0.0  ;;  %v3316_v40 = vadd.f32 %v920_v30, %v3983_v63  ;;  %1015 = vrot.lane.b32.xlu1 %v982_v4, %s3577_s2  ;;  %v922_v27 = vpop.f32.mrb[9].mxu0  ;;  %v3145_v4 = vpack.c.bf16 %v1077_v59, %v1076_v56  ;;  %v1078_v30 = vld [vmem:[#allocation7 + $0x10] sm:$0xff]  ;;  %v1372_v56 = vld [vmem:[#allocation7 + $0xb8] sm:$0xff] }
 0x1ba   :  { %v984_v34 = vmax.f32 %v970_v12, 0.0  ;;  %v3317_v2 = vadd.f32 %v922_v27, %v3985_v5 }
 0x1bb   :  { %v4051_v52 = vadd.f32 %v3316_v40, %v4000_v24  ;;  %1017 = vrot.lane.b32.xlu0 %v983_v51, %s3577_s2 }
 0x1bc   :  { %v972_v15 = vadd.f32 %v3317_v2, %v4004_v26  ;;  %v926_v19 = vpop.f32.mrb[10].mxu0 }
 0x1bd   :  { %v985_v54 = vmax.f32 %v4051_v52, 0.0  ;;  %v3318_v58 = vadd.f32 %v926_v19, %v3987_v7  ;;  %1019 = vrot.lane.b32.xlu1 %v984_v34, %s3577_s2  ;;  %v928_v63 = vpop.f32.mrb[11].mxu0 }
 0x1be   :  { %v986_v14 = vmax.f32 %v972_v15, 0.0  ;;  %v3319_v17 = vadd.f32 %v928_v63, %v3989_v9  ;;  %v1080_v63 = vld [vmem:[#allocation7 + $0x20] sm:$0xff] }
 0x1bf   :  { %v4060_v5 = vadd.f32 %v3318_v58, %v4000_v24  ;;  %1021 = vrot.lane.b32.xlu0 %v985_v54, %s3577_s2 }
 0x1c0   :  { %v974_v18 = vadd.f32 %v3319_v17, %v4004_v26  ;;  %v932_v20 = vpop.f32.mrb[12].mxu0 }
 0x1c1   :  { %v987_v22 = vmax.f32 %v4060_v5, 0.0  ;;  %v3320_v23 = vadd.f32 %v932_v20, %v3991_v11  ;;  %1023 = vrot.lane.b32.xlu1 %v986_v14, %s3577_s2  ;;  %v934_v7 = vpop.f32.mrb[13].mxu0  ;;  %v1081_v14 = vld [vmem:[#allocation7 + $0x28] sm:$0xff] }
 0x1c2   :  { %v988_v28 = vmax.f32 %v974_v18, 0.0  ;;  %v3321_v29 = vadd.f32 %v934_v7, %v3993_v13 }
 0x1c3   :  { %v4069_v9 = vadd.f32 %v3320_v23, %v4000_v24  ;;  %1025 = vrot.lane.b32.xlu0 %v987_v22, %s3577_s2 }
 0x1c4   :  { %v976_v21 = vadd.f32 %v3321_v29, %v4004_v26 }
 0x1c5   :  { %v989_v31 = vmax.f32 %v4069_v9, 0.0  ;;  %1027 = vrot.lane.b32.xlu1 %v988_v28, %s3577_s2 }
 0x1c6   :  { %v990_v11 = vmax.f32 %v976_v21, 0.0 }
 0x1c7   :  { %1029 = vrot.lane.b32.xlu0 %v989_v31, %s3577_s2 }
 0x1c9   :  { %1031 = vrot.lane.b32.xlu1 %v990_v11, %s3577_s2  ;;  %v1082_v11 = vld [vmem:[#allocation7 + $0x30] sm:$0xff] }
 0x21f   :  { %v1006_v13 = vpop.permute.xlu0 %1005 }
 0x223   :  { %v1008_v24 = vpop.permute.xlu0 %1007  ;;  %v1010_v33 = vpop.permute.xlu1 %1009 }
 0x224   :  { %v1034_v36 = vsel %vm1033_vm9, %v1006_v13, %v1008_v24  ;;  %v1083_v13 = vld [vmem:[#allocation7 + $0x38] sm:$0xff] }
 0x225   :  { %v4084_v26 = vmax.f32 %v977_v35, %v1034_v36  ;;  %v3154_v9 = vpack.c.bf16 %v1083_v13, %v1082_v11  ;;  %v1658_v11 = vld [vmem:[#allocation7 + $0x120] sm:$0xff]  ;;  %v1659_v13 = vld [vmem:[#allocation7 + $0x128] sm:$0xff] }
 0x227   :  { %v1012_v37 = vpop.permute.xlu1 %1011  ;;  %v1055_v42 = vrot.slane %v4084_v26, 1 }
 0x228   :  { %v1035_v38 = vsel %vm1033_vm9, %v1010_v33, %v1012_v37 }
 0x229   :  { %v1049_v16 = vmax.f32 %v979_v44, %v1035_v38  ;;  %v1014_v39 = vpop.permute.xlu0 %1013 }
 0x22b   :  { %v1056_v43 = vrot.slane %v1049_v16, 1  ;;  %v1016_v45 = vpop.permute.xlu1 %1015 }
 0x22c   :  { %v1036_v46 = vsel %vm1033_vm9, %v1014_v39, %v1016_v45 }
 0x22d   :  { %v1067_v32 = vsel %vm148_vm4, %v1055_v42, %v1056_v43  ;;  %v1050_v35 = vmax.f32 %v981_v61, %v1036_v46  ;;  %v1018_v47 = vpop.permute.xlu0 %1017 }
 0x22e   :  { %v4098_v41 = vmax.f32 %v4084_v26, %v1067_v32  ;;  %v1084_v26 = vld [vmem:[#allocation7 + $0x40] sm:$0xff] }
 0x22f   :  { %v1057_v48 = vrot.slane %v1050_v35, 1  ;;  %v1020_v49 = vpop.permute.xlu1 %1019 }
 0x230   :  { %v1037_v44 = vsel %vm1033_vm9, %v1018_v47, %v1020_v49  ;;  %v1085_v1 = vrot.slane %v4098_v41, 2  ;;  %v1368_v47 = vld [vmem:[#allocation7 + $0x98] sm:$0xff] }
 0x231   :  { %v1066_v50 = vsel %vm148_vm4, %v1056_v43, %v1057_v48  ;;  %v1051_v53 = vmax.f32 %v983_v51, %v1037_v44  ;;  %v1022_v55 = vpop.permute.xlu0 %1021  ;;  %v1079_v51 = vld [vmem:[#allocation7 + $0x18] sm:$0xff]  ;;  %v1369_v44 = vld [vmem:[#allocation7 + $0xa0] sm:$0xff] }
 0x232   :  { %v4103_v60 = vmax.f32 %v1049_v16, %v1066_v50  ;;  %v3148_v19 = vpack.c.bf16 %v1079_v51, %v1078_v30  ;;  %v1370_v50 = vld [vmem:[#allocation7 + $0xa8] sm:$0xff]  ;;  %v1523_v51 = vld [vmem:[#allocation7 + $0xf0] sm:$0xff] }
 0x233   :  { %v1058_v62 = vrot.slane %v1051_v53, 1  ;;  %v1024_v57 = vpop.permute.xlu1 %1023  ;;  %v1522_v30 = vld [vmem:[#allocation7 + $0xe8] sm:$0xff] }
 0x234   :  { %v1038_v61 = vsel %vm1033_vm9, %v1022_v55, %v1024_v57  ;;  %v1086_v3 = vrot.slane %v4103_v60, 2  ;;  %v1371_v55 = vld [vmem:[#allocation7 + $0xb0] sm:$0xff]  ;;  %v1374_v57 = vld [vmem:[#allocation7 + $0xc8] sm:$0xff] }
 0x235   :  { %v1065_v6 = vsel %vm148_vm4, %v1057_v48, %v1058_v62  ;;  %v1052_v8 = vmax.f32 %v985_v54, %v1038_v61  ;;  %v1026_v12 = vpop.permute.xlu0 %1025  ;;  %v3163_v59 = vpack.c.bf16 %v1372_v56, %v1371_v55 }
 0x236   :  { %v4110_v40 = vmax.f32 %v1050_v35, %v1065_v6  ;;  %v1097_v27 = vsel %vm442_vm7, %v1085_v1, %v1086_v3  ;;  %v1367_v35 = vld [vmem:[#allocation7 + $0x90] sm:$0xff]  ;;  %v1353_v6 = vrot.slane %v4103_v60, 4 }
 0x237   :  { %v1059_v34 = vrot.slane %v1052_v8, 1  ;;  %2768 = vmatmul.mubr.msk.f32.vlgmr.msra.gmra.mrb[10].mxu1 %vm1109_vm10, %v1097_v27  ;;  %v1028_v2 = vpop.permute.xlu1 %1027  ;;  %v3157_v49 = vpack.c.bf16 %v1368_v47, %v1367_v35 }
 0x238   :  { %v1039_v52 = vsel %vm1033_vm9, %v1026_v12, %v1028_v2  ;;  %2770 = vmatprep.mubr.msk.f32.mxu1 %vm3578_vm8, %v3574_v0  ;;  %v1087_v15 = vrot.slane %v4110_v40, 2  ;;  %3146 = vmatpush3.bf16.msra.mxu1 %v3145_v4  ;;  %v1521_v4 = vld [vmem:[#allocation7 + $0xe0] sm:$0xff]  ;;  %v3172_v2 = vpack.c.bf16 %v1523_v51, %v1522_v30 }
 0x239   :  { %v1064_v54 = vsel %vm148_vm4, %v1058_v62, %v1059_v34  ;;  %v1053_v58 = vmax.f32 %v987_v22, %v1039_v52  ;;  %3147 = vmatprep.subr.bf16.mxu1 %v3576_v25  ;;  %v1030_v23 = vpop.permute.xlu0 %1029  ;;  %v3151_v22 = vpack.c.bf16 %v1081_v14, %v1080_v63  ;;  %v1373_v62 = vld [vmem:[#allocation7 + $0xc0] sm:$0xff]  ;;  %v1524_v52 = vld [vmem:[#allocation7 + $0xf8] sm:$0xff]  ;;  %v1526_v63 = vld [vmem:[#allocation7 + $0x108] sm:$0xff] }
 0x23a   :  { %v4126_v17 = vmax.f32 %v1051_v53, %v1064_v54  ;;  %v1096_v18 = vsel %vm442_vm7, %v1086_v3, %v1087_v15  ;;  %v3160_v53 = vpack.c.bf16 %v1370_v50, %v1369_v44  ;;  %v3166_v61 = vpack.c.bf16 %v1374_v57, %v1373_v62  ;;  %v1520_v3 = vld [vmem:[#allocation7 + $0xd8] sm:$0xff]  ;;  %v1527_v14 = vld [vmem:[#allocation7 + $0x110] sm:$0xff] }
 0x23b   :  { %v1060_v20 = vrot.slane %v1053_v58, 1  ;;  %2771 = vmatmul.mubr.msk.f32.gmra.mrb[12].mxu1 %vm1109_vm10, %v1096_v18  ;;  %v1032_v7 = vpop.permute.xlu1 %1031  ;;  %v3169_v12 = vpack.c.bf16 %v1521_v4, %v1520_v3 }
 0x23c   :  { %v1040_v28 = vsel %vm1033_vm9, %v1030_v23, %v1032_v7  ;;  %2773 = vmatprep.mubr.msk.f32.mxu1 %vm3578_vm8, %v3574_v0  ;;  %v1088_v5 = vrot.slane %v4126_v17, 2  ;;  %3149 = vmatpush3.bf16.msra.mxu1 %v3148_v19  ;;  %v1355_v54 = vrot.slane %v4126_v17, 4  ;;  %v3178_v23 = vpack.c.bf16 %v1527_v14, %v1526_v63 }
 0x23d   :  { %v1063_v29 = vsel %vm148_vm4, %v1059_v34, %v1060_v20  ;;  %v1054_v21 = vmax.f32 %v989_v31, %v1040_v28  ;;  %3150 = vmatprep.subr.bf16.mxu1 %v3576_v25  ;;  %v1354_v34 = vrot.slane %v4110_v40, 4  ;;  %v1507_v35 = vrot.slane %v4126_v17, 6 }
 0x23e   :  { %v4140_v24 = vmax.f32 %v1052_v8, %v1063_v29  ;;  %v1095_v33 = vsel %vm442_vm7, %v1087_v15, %v1088_v5  ;;  %v1352_v8 = vrot.slane %v4098_v41, 4  ;;  %v1525_v15 = vld [vmem:[#allocation7 + $0x100] sm:$0xff] }
 0x23f   :  { %v1061_v36 = vrot.slane %v1054_v21, 1  ;;  %2774 = vmatmul.mubr.msk.f32.gmra.mrb[14].mxu1 %vm1109_vm10, %v1095_v33  ;;  %v1363_v19 = vsel %vm786_vm6, %v1353_v6, %v1354_v34  ;;  %v1362_v18 = vsel %vm786_vm6, %v1354_v34, %v1355_v54 }
 0x240   :  { %2776 = vmatprep.mubr.msk.f32.mxu1 %vm3578_vm8, %v3574_v0  ;;  %v1089_v37 = vrot.slane %v4140_v24, 2  ;;  %3152 = vmatpush3.bf16.msra.mxu1 %v3151_v22  ;;  %v1364_v27 = vsel %vm786_vm6, %v1352_v8, %v1353_v6  ;;  %v1508_v50 = vrot.slane %v4140_v24, 6 }
 0x241   :  { %v1062_v31 = vsel %vm148_vm4, %v1060_v20, %v1061_v36  ;;  %v1068_v38 = vsel %vm148_vm4, %v1061_v36, %v1055_v42  ;;  %3153 = vmatprep.subr.bf16.mxu1 %v3576_v25  ;;  %v1356_v20 = vrot.slane %v4140_v24, 4  ;;  %v1505_v36 = vrot.slane %v4103_v60, 6 }
 0x242   :  { %v4155_v16 = vmax.f32 %v1053_v58, %v1062_v31  ;;  %v4157_v39 = vmax.f32 %v1054_v21, %v1068_v38  ;;  %v1094_v43 = vsel %vm442_vm7, %v1088_v5, %v1089_v37  ;;  %v3175_v58 = vpack.c.bf16 %v1525_v15, %v1524_v52  ;;  %v1528_v5 = vld [vmem:[#allocation7 + $0x118] sm:$0xff]  ;;  %v1660_v31 = vld [vmem:[#allocation7 + $0x130] sm:$0xff] }
 0x243   :  { %2777 = vmatmul.mubr.msk.f32.gmra.mrb[16].mxu1 %vm1109_vm10, %v1094_v43  ;;  %v1361_v7 = vsel %vm786_vm6, %v1355_v54, %v1356_v20  ;;  %v1661_v38 = vld [vmem:[#allocation7 + $0x138] sm:$0xff]  ;;  %v1514_v55 = vsel %vm1511_vm11, %v1507_v35, %v1508_v50 }
 0x244   :  { %2779 = vmatprep.mubr.msk.f32.mxu1 %vm3578_vm8, %v3574_v0  ;;  %v1090_v45 = vrot.slane %v4155_v16, 2  ;;  %3155 = vmatpush3.bf16.msra.mxu1 %v3154_v9  ;;  %v1091_v46 = vrot.slane %v4157_v39, 2  ;;  %v1357_v28 = vrot.slane %v4155_v16, 4  ;;  %v1358_v29 = vrot.slane %v4157_v39, 4 }
 0x245   :  { %2804 = vmatprep.subr.mxu1 %v3574_v0  ;;  %v3181_v9 = vpack.c.bf16 %v1659_v13, %v1658_v11  ;;  %v1509_v56 = vrot.slane %v4155_v16, 6  ;;  %v1510_v57 = vrot.slane %v4157_v39, 6 }
 0x246   :  { %v1093_v42 = vsel %vm442_vm7, %v1089_v37, %v1090_v45  ;;  %v1092_v32 = vsel %vm442_vm7, %v1090_v45, %v1091_v46  ;;  %v1098_v48 = vsel %vm442_vm7, %v1091_v46, %v1085_v1  ;;  %v1375_v1 = vld [vmem:[#allocation7 + $0xd0] sm:$0xff]  ;;  %v1360_v22 = vsel %vm786_vm6, %v1356_v20, %v1357_v28  ;;  %v1663_v46 = vld [vmem:[#allocation7 + $0x148] sm:$0xff] }
 0x247   :  { %2780 = vmatmul.mubr.msk.f32.gmra.mrb[18].mxu1 %vm1109_vm10, %v1093_v42  ;;  %v1359_v21 = vsel %vm786_vm6, %v1357_v28, %v1358_v29  ;;  %v1365_v33 = vsel %vm786_vm6, %v1358_v29, %v1352_v8  ;;  %v1504_v37 = vrot.slane %v4098_v41, 6  ;;  %v1506_v45 = vrot.slane %v4110_v40, 6  ;;  %v1662_v42 = vld [vmem:[#allocation7 + $0x140] sm:$0xff] }
 0x248   :  { %2782 = vmatprep.mubr.msk.f32.mxu1 %vm3578_vm8, %v3574_v0  ;;  %2805 = vmatpush3.msra.mxu1 %v1084_v26  ;;  %v3184_v26 = vpack.c.bf16 %v1661_v38, %v1660_v31  ;;  %v3187_v47 = vpack.c.bf16 %v1663_v46, %v1662_v42  ;;  %v1513_v62 = vsel %vm1511_vm11, %v1508_v50, %v1509_v56 }
 0x249   :  { %3156 = vmatprep.subr.bf16.mxu1 %v3576_v25  ;;  %v1517_v43 = vsel %vm1511_vm11, %v1504_v37, %v1505_v36  ;;  %v1515_v44 = vsel %vm1511_vm11, %v1506_v45, %v1507_v35 }
 0x24b   :  { %2783 = vmatmul.mubr.msk.f32.gmra.mrb[20].mxu1 %vm1109_vm10, %v1092_v32  ;;  %v1516_v32 = vsel %vm1511_vm11, %v1505_v36, %v1506_v45 }
 0x24c   :  { %2785 = vmatprep.mubr.msk.f32.mxu1 %vm3578_vm8, %v3574_v0 }
 0x24f   :  { %2786 = vmatmul.mubr.msk.f32.gmra.mrb[22].mxu1 %vm1109_vm10, %v1098_v48  ;;  %v1664_v48 = vld [vmem:[#allocation7 + $0x150] sm:$0xff] }
 0x250   :  { %2806 = vmatprep.mubr.msk.f32.mxu1 %vm3578_vm8, %v3574_v0 }
 0x253   :  { %2807 = vmatmul.mubr.msk.f32.vlgmr.msra.gmra.mrb[24].mxu1 %vm1109_vm10, %v4098_v41 }
 0x254   :  { %2809 = vmatprep.mubr.msk.f32.mxu1 %vm3578_vm8, %v3574_v0  ;;  %3158 = vmatpush3.bf16.msra.mxu1 %v3157_v49  ;;  %v1665_v49 = vld [vmem:[#allocation7 + $0x158] sm:$0xff] }
 0x255   :  { %3159 = vmatprep.subr.bf16.mxu1 %v3576_v25 }
 0x257   :  { %2810 = vmatmul.mubr.msk.f32.gmra.mrb[26].mxu1 %vm1109_vm10, %v4103_v60 }
 0x258   :  { %2812 = vmatprep.mubr.msk.f32.mxu1 %vm3578_vm8, %v3574_v0  ;;  %3161 = vmatpush3.bf16.msra.mxu1 %v3160_v53  ;;  %v3190_v53 = vpack.c.bf16 %v1665_v49, %v1664_v48 }
 0x259   :  { %3162 = vmatprep.subr.bf16.mxu1 %v3576_v25 }
 0x25b   :  { %2813 = vmatmul.mubr.msk.f32.gmra.mrb[28].mxu1 %vm1109_vm10, %v4110_v40 }
 0x25c   :  { %2815 = vmatprep.mubr.msk.f32.mxu1 %vm3578_vm8, %v3574_v0  ;;  %3164 = vmatpush3.bf16.msra.mxu1 %v3163_v59  ;;  %v1666_v59 = vld [vmem:[#allocation7 + $0x160] sm:$0xff] }
 0x25d   :  { %3165 = vmatprep.subr.bf16.mxu1 %v3576_v25 }
 0x25f   :  { %2816 = vmatmul.mubr.msk.f32.gmra.mrb[30].mxu1 %vm1109_vm10, %v4126_v17 }
 0x260   :  { %2818 = vmatprep.mubr.msk.f32.mxu1 %vm3578_vm8, %v3574_v0  ;;  %3167 = vmatpush3.bf16.msra.mxu1 %v3166_v61  ;;  %v1512_v61 = vsel %vm1511_vm11, %v1509_v56, %v1510_v57 }
 0x261   :  { %2843 = vmatprep.subr.mxu1 %v3574_v0 }
 0x263   :  { %2819 = vmatmul.mubr.msk.f32.gmra.mrb[32].mxu1 %vm1109_vm10, %v4140_v24 }
 0x264   :  { %2821 = vmatprep.mubr.msk.f32.mxu1 %vm3578_vm8, %v3574_v0  ;;  %2844 = vmatpush3.msra.mxu1 %v1375_v1  ;;  %v1518_v1 = vsel %vm1511_vm11, %v1510_v57, %v1504_v37 }
 0x265   :  { %3168 = vmatprep.subr.bf16.mxu1 %v3576_v25 }
 0x267   :  { %2822 = vmatmul.mubr.msk.f32.gmra.mrb[34].mxu1 %vm1109_vm10, %v4155_v16 }
 0x268   :  { %2824 = vmatprep.mubr.msk.f32.mxu1 %vm3578_vm8, %v3574_v0 }
 0x26b   :  { %2825 = vmatmul.mubr.msk.f32.gmra.mrb[36].mxu1 %vm1109_vm10, %v4157_v39 }
 0x26c   :  { %2845 = vmatprep.mubr.msk.f32.mxu1 %vm3578_vm8, %v3574_v0 }
 0x26f   :  { %2846 = vmatmul.mubr.msk.f32.vlgmr.msra.gmra.mrb[38].mxu1 %vm1109_vm10, %v1364_v27 }
 0x270   :  { %2848 = vmatprep.mubr.msk.f32.mxu1 %vm3578_vm8, %v3574_v0  ;;  %3170 = vmatpush3.bf16.msra.mxu1 %v3169_v12 }
 0x271   :  { %3171 = vmatprep.subr.bf16.mxu1 %v3576_v25 }
 0x273   :  { %2849 = vmatmul.mubr.msk.f32.gmra.mrb[40].mxu1 %vm1109_vm10, %v1363_v19 }
 0x274   :  { %2851 = vmatprep.mubr.msk.f32.mxu1 %vm3578_vm8, %v3574_v0  ;;  %3173 = vmatpush3.bf16.msra.mxu1 %v3172_v2 }
 0x275   :  { %3174 = vmatprep.subr.bf16.mxu1 %v3576_v25 }
 0x277   :  { %2852 = vmatmul.mubr.msk.f32.gmra.mrb[42].mxu1 %vm1109_vm10, %v1362_v18 }
 0x278   :  { %2854 = vmatprep.mubr.msk.f32.mxu1 %vm3578_vm8, %v3574_v0  ;;  %3176 = vmatpush3.bf16.msra.mxu1 %v3175_v58 }
 0x279   :  { %3177 = vmatprep.subr.bf16.mxu1 %v3576_v25 }
 0x27b   :  { %2855 = vmatmul.mubr.msk.f32.gmra.mrb[44].mxu1 %vm1109_vm10, %v1361_v7 }
 0x27c   :  { %2857 = vmatprep.mubr.msk.f32.mxu1 %vm3578_vm8, %v3574_v0  ;;  %3179 = vmatpush3.bf16.msra.mxu1 %v3178_v23 }
 0x27d   :  { %2882 = vmatprep.subr.mxu1 %v3574_v0 }
 0x27f   :  { %2858 = vmatmul.mubr.msk.f32.gmra.mrb[46].mxu1 %vm1109_vm10, %v1360_v22 }
 0x280   :  { %2860 = vmatprep.mubr.msk.f32.mxu1 %vm3578_vm8, %v3574_v0  ;;  %2883 = vmatpush3.msra.mxu1 %v1528_v5 }
 0x281   :  { %3180 = vmatprep.subr.bf16.mxu1 %v3576_v25 }
 0x283   :  { %2861 = vmatmul.mubr.msk.f32.gmra.mrb[48].mxu1 %vm1109_vm10, %v1359_v21 }
 0x284   :  { %2863 = vmatprep.mubr.msk.f32.mxu1 %vm3578_vm8, %v3574_v0 }
 0x287   :  { %2864 = vmatmul.mubr.msk.f32.gmra.mrb[50].mxu1 %vm1109_vm10, %v1365_v33 }
 0x288   :  { %2884 = vmatprep.mubr.msk.f32.mxu1 %vm3578_vm8, %v3574_v0 }
 0x28b   :  { %2885 = vmatmul.mubr.msk.f32.vlgmr.msra.gmra.mrb[52].mxu1 %vm1109_vm10, %v1517_v43 }
 0x28c   :  { %2887 = vmatprep.mubr.msk.f32.mxu1 %vm3578_vm8, %v3574_v0  ;;  %3182 = vmatpush3.bf16.msra.mxu1 %v3181_v9 }
 0x28d   :  { %3183 = vmatprep.subr.bf16.mxu1 %v3576_v25 }
 0x28f   :  { %2888 = vmatmul.mubr.msk.f32.gmra.mrb[54].mxu1 %vm1109_vm10, %v1516_v32 }
 0x290   :  { %2890 = vmatprep.mubr.msk.f32.mxu1 %vm3578_vm8, %v3574_v0  ;;  %3185 = vmatpush3.bf16.msra.mxu1 %v3184_v26 }
 0x291   :  { %3186 = vmatprep.subr.bf16.mxu1 %v3576_v25 }
 0x293   :  { %2891 = vmatmul.mubr.msk.f32.gmra.mrb[56].mxu1 %vm1109_vm10, %v1515_v44 }
 0x294   :  { %2893 = vmatprep.mubr.msk.f32.mxu1 %vm3578_vm8, %v3574_v0  ;;  %3188 = vmatpush3.bf16.msra.mxu1 %v3187_v47 }
 0x295   :  { %3189 = vmatprep.subr.bf16.mxu1 %v3576_v25 }
 0x297   :  { %2894 = vmatmul.mubr.msk.f32.gmra.mrb[58].mxu1 %vm1109_vm10, %v1514_v55 }
 0x298   :  { %2896 = vmatprep.mubr.msk.f32.mxu1 %vm3578_vm8, %v3574_v0  ;;  %3191 = vmatpush3.bf16.msra.mxu1 %v3190_v53 }
 0x299   :  { %2921 = vmatprep.subr.mxu1 %v3574_v0 }
 0x29b   :  { %2897 = vmatmul.mubr.msk.f32.gmra.mrb[60].mxu1 %vm1109_vm10, %v1513_v62 }
 0x29c   :  { %2899 = vmatprep.mubr.msk.f32.mxu1 %vm3578_vm8, %v3574_v0  ;;  %2922 = vmatpush3.msra.mxu1 %v1666_v59 }
 0x29d   :  { %3201 = vmatprep.subr.bf16.mxu1 %v3576_v25 }
 0x29f   :  { %2900 = vmatmul.mubr.msk.f32.gmra.mrb[62].mxu1 %vm1109_vm10, %v1512_v61 }
 0x2a0   :  { %2902 = vmatprep.mubr.msk.f32.mxu1 %vm3578_vm8, %v3574_v0 }
 0x2a3   :  { %2903 = vmatmul.mubr.msk.f32.gmra.mrb[64].mxu1 %vm1109_vm10, %v1518_v1 }
 0x2a4   :  { %2923 = vmatprep.mubr.msk.f32.mxu1 %vm3578_vm8, %v3574_v0 }
 0x2a7   :  { %2924 = vmatmul.mubr.msk.f32.vlgmr.msra.gmra.mrb[66].mxu1 %vm1109_vm10, %v4103_v60 }
 0x2a8   :  { %2926 = vmatprep.mubr.msk.f32.mxu1 %vm3578_vm8, %v3574_v0 }
 0x2ab   :  { %2927 = vmatmul.mubr.msk.f32.gmra.mrb[68].mxu1 %vm1109_vm10, %v4110_v40 }
 0x2ac   :  { %2929 = vmatprep.mubr.msk.f32.mxu1 %vm3578_vm8, %v3574_v0 }
 0x2af   :  { %2930 = vmatmul.mubr.msk.f32.gmra.mrb[70].mxu1 %vm1109_vm10, %v4126_v17 }
 0x2b0   :  { %2932 = vmatprep.mubr.msk.f32.mxu1 %vm3578_vm8, %v3574_v0 }
 0x2b3   :  { %2933 = vmatmul.mubr.msk.f32.gmra.mrb[72].mxu1 %vm1109_vm10, %v4140_v24 }
 0x2b4   :  { %2935 = vmatprep.mubr.msk.f32.mxu1 %vm3578_vm8, %v3574_v0 }
 0x2b7   :  { %2936 = vmatmul.mubr.msk.f32.gmra.mrb[74].mxu1 %vm1109_vm10, %v4155_v16 }
 0x2b8   :  { %2938 = vmatprep.mubr.msk.f32.mxu1 %vm3578_vm8, %v3574_v0 }
 0x2bb   :  { %2939 = vmatmul.mubr.msk.f32.gmra.mrb[76].mxu1 %vm1109_vm10, %v4157_v39 }
 0x2bc   :  { %2941 = vmatprep.mubr.msk.f32.mxu1 %vm3578_vm8, %v3574_v0 }
 0x2bf   :  { %2942 = vmatmul.mubr.msk.f32.gmra.mrb[78].mxu1 %vm1109_vm10, %v4098_v41 }
 0x2c0   :  { %2975 = vmatprep.mubr.msk.f32.mxu1 %vm3578_vm8, %v3574_v0 }
 0x30a   :  { %v1197_v60 = vpop.f32.mrb[10].mxu1 }
 0x30b   :  { %v2769_v40 = vpop.f32.mrb[11].mxu1 }
 0x30e   :  { %v1202_v17 = vpop.f32.mrb[12].mxu1 }
 0x30f   :  { %v2772_v24 = vpop.f32.mrb[13].mxu1 }
 0x312   :  { %v1207_v16 = vpop.f32.mrb[14].mxu1 }
 0x313   :  { %v2775_v3 = vpop.f32.mrb[15].mxu1 }
 0x316   :  { %v1212_v4 = vpop.f32.mrb[16].mxu1 }
 0x317   :  { %v2778_v6 = vpop.f32.mrb[17].mxu1 }
 0x31a   :  { %v1217_v8 = vpop.f32.mrb[18].mxu1 }
 0x31b   :  { %v2781_v12 = vpop.f32.mrb[19].mxu1 }
 0x31e   :  { %v1222_v39 = vpop.f32.mrb[20].mxu1 }
 0x31f   :  { %v2784_v30 = vpop.f32.mrb[21].mxu1 }
 0x322   :  { %v1227_v51 = vpop.f32.mrb[22].mxu1 }
 0x323   :  { %v2787_v27 = vpop.f32.mrb[23].mxu1 }
 0x326   :  { %v1318_v34 = vpop.f32.mrb[24].mxu1 }
 0x327   :  { %v1319_v2 = vadd.f32 %v1318_v34, %v1197_v60  ;;  %v2808_v41 = vpop.f32.mrb[25].mxu1 }
 0x32a   :  { %v1323_v52 = vpop.f32.mrb[26].mxu1 }
 0x32b   :  { %v1324_v15 = vadd.f32 %v1323_v52, %v1202_v17  ;;  %v2811_v19 = vpop.f32.mrb[27].mxu1  ;;  %v2557_v52 = vld [vmem:[%s4443_s4] ss:$0 sm:$0xff] }
 0x32e   :  { %v1328_v54 = vpop.f32.mrb[28].mxu1 }
 0x32f   :  { %v1329_v58 = vadd.f32 %v1328_v54, %v1207_v16  ;;  %v2814_v63 = vpop.f32.mrb[29].mxu1 }
 0x332   :  { %v1333_v14 = vpop.f32.mrb[30].mxu1 }
 0x333   :  { %v1334_v18 = vadd.f32 %v1333_v14, %v1212_v4  ;;  %v2817_v20 = vpop.f32.mrb[31].mxu1 }
 0x336   :  { %v1338_v23 = vpop.f32.mrb[32].mxu1 }
 0x337   :  { %v1339_v7 = vadd.f32 %v1338_v23, %v1217_v8  ;;  %v2820_v28 = vpop.f32.mrb[33].mxu1 }
 0x33a   :  { %v1343_v5 = vpop.f32.mrb[34].mxu1 }
 0x33b   :  { %v1344_v22 = vadd.f32 %v1343_v5, %v1222_v39  ;;  %v2823_v29 = vpop.f32.mrb[35].mxu1 }
 0x33e   :  { %v1348_v21 = vpop.f32.mrb[36].mxu1 }
 0x33f   :  { %v1349_v11 = vadd.f32 %v1348_v21, %v1227_v51  ;;  %v2826_v13 = vpop.f32.mrb[37].mxu1 }
 0x342   :  { %v1463_v33 = vpop.f32.mrb[38].mxu1 }
 0x343   :  { %v1497_v36 = vadd.f32 %v1463_v33, %v1319_v2  ;;  %v2847_v37 = vpop.f32.mrb[39].mxu1 }
 0x346   :  { %v1468_v9 = vpop.f32.mrb[40].mxu1 }
 0x347   :  { %v1498_v31 = vadd.f32 %v1468_v9, %v1324_v15  ;;  %v2850_v38 = vpop.f32.mrb[41].mxu1 }
 0x34a   :  { %v1473_v43 = vpop.f32.mrb[42].mxu1 }
 0x34b   :  { %v1499_v45 = vadd.f32 %v1473_v43, %v1329_v58  ;;  %v2853_v26 = vpop.f32.mrb[43].mxu1 }
 0x34e   :  { %v1478_v42 = vpop.f32.mrb[44].mxu1 }
 0x34f   :  { %v1500_v46 = vadd.f32 %v1478_v42, %v1334_v18  ;;  %v2856_v32 = vpop.f32.mrb[45].mxu1 }
 0x352   :  { %v1483_v35 = vpop.f32.mrb[46].mxu1 }
 0x353   :  { %v1501_v47 = vadd.f32 %v1483_v35, %v1339_v7  ;;  %v2859_v48 = vpop.f32.mrb[47].mxu1 }
 0x356   :  { %v1488_v49 = vpop.f32.mrb[48].mxu1 }
 0x357   :  { %v1502_v44 = vadd.f32 %v1488_v49, %v1344_v22  ;;  %v2862_v50 = vpop.f32.mrb[49].mxu1 }
 0x35a   :  { %v1493_v53 = vpop.f32.mrb[50].mxu1 }
 0x35b   :  { %v1503_v55 = vadd.f32 %v1493_v53, %v1349_v11  ;;  %v2865_v56 = vpop.f32.mrb[51].mxu1 }
 0x35e   :  { %v1616_v59 = vpop.f32.mrb[52].mxu1 }
 0x35f   :  { %v1650_v62 = vadd.f32 %v1616_v59, %v1497_v36  ;;  %v2886_v57 = vpop.f32.mrb[53].mxu1 }
 0x362   :  { %v1621_v61 = vpop.f32.mrb[54].mxu1 }
 0x363   :  { %v1651_v1 = vadd.f32 %v1621_v61, %v1498_v31  ;;  %v2889_v60 = vpop.f32.mrb[55].mxu1 }
 0x366   :  { %v1626_v40 = vpop.f32.mrb[56].mxu1 }
 0x367   :  { %v1652_v17 = vadd.f32 %v1626_v40, %v1499_v45  ;;  %v2892_v24 = vpop.f32.mrb[57].mxu1 }
 0x36a   :  { %v1631_v16 = vpop.f32.mrb[58].mxu1 }
 0x36b   :  { %v1653_v3 = vadd.f32 %v1631_v16, %v1500_v46  ;;  %v2895_v4 = vpop.f32.mrb[59].mxu1 }
 0x36e   :  { %v1636_v6 = vpop.f32.mrb[60].mxu1 }
 0x36f   :  { %v1654_v8 = vadd.f32 %v1636_v6, %v1501_v47  ;;  %v2898_v12 = vpop.f32.mrb[61].mxu1 }
 0x372   :  { %v1641_v39 = vpop.f32.mrb[62].mxu1 }
 0x373   :  { %v1655_v30 = vadd.f32 %v1641_v39, %v1502_v44  ;;  %v2901_v51 = vpop.f32.mrb[63].mxu1 }
 0x376   :  { %v1646_v27 = vpop.f32.mrb[64].mxu1 }
 0x377   :  { %v1656_v34 = vadd.f32 %v1646_v27, %v1503_v55  ;;  %v2904_v2 = vpop.f32.mrb[65].mxu1 }
 0x37a   :  { %v1733_v41 = vpop.f32.mrb[66].mxu1 }
 0x37b   :  { %v1767_v15 = vadd.f32 %v1733_v41, %v1650_v62  ;;  %v2925_v19 = vpop.f32.mrb[67].mxu1 }
 0x37d   :  { %v1781_v54 = vadd.f32 %v2557_v52, %v1767_v15 }
 0x37e   :  { %v1738_v58 = vpop.f32.mrb[68].mxu1 }
 0x37f   :  { %v1788_v63 = vmax.f32 %v1781_v54, 0.0  ;;  %v1768_v14 = vadd.f32 %v1738_v58, %v1651_v1  ;;  %v2928_v18 = vpop.f32.mrb[69].mxu1 }
 0x381   :  { %1802 = vrot.lane.b32.xlu0 %v1788_v63, %s3579_s24  ;;  %v1782_v23 = vadd.f32 %v2557_v52, %v1768_v14 }
 0x382   :  { %v1743_v20 = vpop.f32.mrb[70].mxu1 }
 0x383   :  { %v1769_v7 = vadd.f32 %v1743_v20, %v1652_v17  ;;  %v2931_v28 = vpop.f32.mrb[71].mxu1  ;;  %v1789_v29 = vmax.f32 %v1782_v23, 0.0 }
 0x385   :  { %v1783_v5 = vadd.f32 %v2557_v52, %v1769_v7 }
 0x386   :  { %v1748_v22 = vpop.f32.mrb[72].mxu1 }
 0x387   :  { %v1790_v21 = vmax.f32 %v1783_v5, 0.0  ;;  %v1770_v11 = vadd.f32 %v1748_v22, %v1653_v3  ;;  %v2934_v13 = vpop.f32.mrb[73].mxu1 }
 0x388   :  { %v2559_v13 = vld [vmem:[%s4444_s5 + $0x2] sm:$0x3] }
 0x389   :  { %v3385_v33 = vpack.i.bf16 %v1790_v21, %v1789_v29  ;;  %v1784_v37 = vadd.f32 %v2557_v52, %v1770_v11  ;;  %v1851_v11 = vld [vmem:[%s4444_s5] sm:$0x3] }
 0x38a   :  { %v1753_v36 = vpop.f32.mrb[74].mxu1 }
 0x38b   :  { %v1771_v9 = vadd.f32 %v1753_v36, %v1654_v8  ;;  %3386 = vrot.lane.b32.xlu1 %v3385_v33, %s3579_s24  ;;  %v2937_v31 = vpop.f32.mrb[75].mxu1  ;;  %v1791_v45 = vmax.f32 %v1784_v37, 0.0  ;;  %v2561_v33 = vld [vmem:[%s4444_s5 + $0x4] sm:$0x3]  ;;  %v2178_v37 = vld [vmem:[#allocation8 + $0x88] sm:$0xff] }
 0x38c   :  { %v2177_v36 = vld [vmem:[#allocation8 + $0x80] sm:$0xff] }
 0x38d   :  { %v1785_v38 = vadd.f32 %v2557_v52, %v1771_v9  ;;  %v2161_v9 = vld [vmem:[#allocation8] sm:$0xff]  ;;  %v3228_v31 = vpack.c.bf16 %v2178_v37, %v2177_v36 }
 0x38e   :  { %v1758_v43 = vpop.f32.mrb[76].mxu1 }
 0x38f   :  { %v1792_v26 = vmax.f32 %v1785_v38, 0.0  ;;  %v1772_v42 = vadd.f32 %v1758_v43, %v1655_v30  ;;  %v2940_v46 = vpop.f32.mrb[77].mxu1  ;;  %v2162_v38 = vld [vmem:[#allocation8 + $0x8] sm:$0xff]  ;;  %v2179_v43 = vld [vmem:[#allocation8 + $0x90] sm:$0xff] }
 0x390   :  { %v2163_v46 = vld [vmem:[#allocation8 + $0x10] sm:$0xff] }
 0x391   :  { %v1786_v32 = vadd.f32 %v2557_v52, %v1772_v42  ;;  %v3390_v35 = vpack.i.bf16 %v1792_v26, %v1791_v45 }
 0x392   :  { %v1763_v47 = vpop.f32.mrb[78].mxu1 }
 0x393   :  { %v1793_v48 = vmax.f32 %v1786_v32, 0.0  ;;  %v1773_v49 = vadd.f32 %v1763_v47, %v1656_v34  ;;  %3391 = vrot.lane.b32.xlu0 %v3390_v35, %s3579_s24  ;;  %v2943_v44 = vpop.f32.mrb[79].mxu1  ;;  %v2164_v32 = vld [vmem:[#allocation8 + $0x18] sm:$0xff]  ;;  %v2181_v35 = vld [vmem:[#allocation8 + $0xa0] sm:$0xff]  ;;  %v2182_v47 = vld [vmem:[#allocation8 + $0xa8] sm:$0xff] }
 0x394   :  { %v2165_v44 = vld [vmem:[#allocation8 + $0x20] sm:$0xff] }
 0x395   :  { %v1787_v50 = vadd.f32 %v2557_v52, %v1773_v49  ;;  %1812 = vrot.lane.b32.xlu1 %v1793_v48, %s3579_s24  ;;  %v3236_v49 = vpack.c.bf16 %v2182_v47, %v2181_v35  ;;  %v2282_v35 = vld [vmem:[#allocation10 + $0x58] sm:$0xff] }
 0x397   :  { %v1794_v53 = vmax.f32 %v1787_v50, 0.0  ;;  %v2166_v50 = vld [vmem:[#allocation8 + $0x28] sm:$0xff] }
 0x399   :  { %1814 = vrot.lane.b32.xlu0 %v1794_v53, %s3579_s24 }
 0x3f3   :  { %v1803_v55 = vpop.permute.xlu0 %1802 }
 0x3f4   :  { %v1823_v59 = vmax.f32 %v1788_v63, %v1803_v55  ;;  %v2184_v55 = vld [vmem:[#allocation8 + $0xb8] sm:$0xff] }
 0x3f6   :  { %v1830_v60 = vrot.slane %v1823_v59, 2 }
 0x3fd   :  { %v3387_v56 = vpop.permute.xlu1 %3386 }
 0x3fe   :  { %v3389_v62 = vunpack.i.h.bf16 %v3387_v56  ;;  %v3388_v57 = vunpack.i.l.bf16 %v3387_v56  ;;  %v3238_v56 = vpack.c.bf16 %v2166_v50, %v2165_v44 }
 0x400   :  { %v1825_v61 = vmax.f32 %v1790_v21, %v3389_v62  ;;  %v1824_v1 = vmax.f32 %v1789_v29, %v3388_v57  ;;  %v2167_v62 = vld [vmem:[#allocation8 + $0x30] sm:$0xff]  ;;  %v2168_v57 = vld [vmem:[#allocation8 + $0x38] sm:$0xff] }
 0x402   :  { %v1832_v40 = vrot.slane %v1825_v61, 2  ;;  %v1831_v17 = vrot.slane %v1824_v1, 2 }
 0x404   :  { %v1841_v24 = vsel %vm442_vm7, %v1831_v17, %v1832_v40  ;;  %v1842_v16 = vsel %vm442_vm7, %v1830_v60, %v1831_v17  ;;  %v2169_v17 = vld [vmem:[#allocation8 + $0x40] sm:$0xff] }
 0x405   :  { %v1845_v3 = vmax.f32 %v1824_v1, %v1841_v24  ;;  %v3392_v4 = vpop.permute.xlu0 %3391  ;;  %v1844_v6 = vmax.f32 %v1823_v59, %v1842_v16  ;;  %v2186_v1 = vld [vmem:[#allocation8 + $0xc8] sm:$0xff]  ;;  %v2187_v16 = vld [vmem:[#allocation8 + $0xd0] sm:$0xff] }
 0x406   :  { %v3394_v8 = vunpack.i.h.bf16 %v3392_v4  ;;  %v3393_v12 = vunpack.i.l.bf16 %v3392_v4  ;;  %v2170_v24 = vld [vmem:[#allocation8 + $0x48] sm:$0xff] }
 0x407   :  { %v1813_v39 = vpop.permute.xlu1 %1812  ;;  %v3193_v30 = vpack.c.bf16 %v1845_v3, %v1844_v6  ;;  %v2188_v3 = vld [vmem:[#allocation8 + $0xd8] sm:$0xff]  ;;  %v3246_v4 = vpack.c.bf16 %v2170_v24, %v2169_v17 }
 0x408   :  { %v1827_v51 = vmax.f32 %v1792_v26, %v3394_v8  ;;  %v1826_v27 = vmax.f32 %v1791_v45, %v3393_v12  ;;  %v1828_v34 = vmax.f32 %v1793_v48, %v1813_v39  ;;  %v2180_v45 = vld [vmem:[#allocation8 + $0x98] sm:$0xff]  ;;  %v3230_v26 = vpack.c.bf16 %v2162_v38, %v2161_v9  ;;  %v2171_v8 = vld [vmem:[#allocation8 + $0x50] sm:$0xff]  ;;  %v2189_v39 = vld [vmem:[#allocation8 + $0xe0] sm:$0xff] }
 0x409   :  { %3194 = vmatpush3.bf16.msra.mxu0 %v3193_v30  ;;  %3203 = vmatpush3.bf16.msra.mxu1 %v3193_v30  ;;  %v3232_v42 = vpack.c.bf16 %v2180_v45, %v2179_v43  ;;  %v3234_v48 = vpack.c.bf16 %v2164_v32, %v2163_v46  ;;  %v3248_v6 = vpack.c.bf16 %v2188_v3, %v2187_v16  ;;  %v2172_v12 = vld [vmem:[#allocation8 + $0x58] sm:$0xff]  ;;  %v2277_v38 = vld [vmem:[#allocation10 + $0x30] sm:$0xff]  ;;  %v2370_v3 = vld [vmem:[#allocation11 + $0x28] sm:$0xff] }
 0x40a   :  { %v1834_v2 = vrot.slane %v1827_v51, 2  ;;  %v1833_v41 = vrot.slane %v1826_v27, 2  ;;  %v1835_v52 = vrot.slane %v1828_v34, 2  ;;  %3195 = vmatprep.subr.bf16.mxu0 %v3576_v25  ;;  %3204 = vmatprep.subr.bf16.mxu1 %v3576_v25  ;;  %v2278_v43 = vld [vmem:[#allocation10 + $0x38] sm:$0xff]  ;;  %v2281_v32 = vld [vmem:[#allocation10 + $0x50] sm:$0xff] }
 0x40b   :  { %v1815_v15 = vpop.permute.xlu0 %1814  ;;  %v3270_v45 = vpack.c.bf16 %v2278_v43, %v2277_v38  ;;  %v3276_v47 = vpack.c.bf16 %v2282_v35, %v2281_v32  ;;  %v2368_v24 = vld [vmem:[#allocation11 + $0x18] sm:$0xff] }
 0x40c   :  { %v1839_v19 = vsel %vm442_vm7, %v1833_v41, %v1834_v2  ;;  %v1840_v54 = vsel %vm442_vm7, %v1832_v40, %v1833_v41  ;;  %v1829_v58 = vmax.f32 %v1794_v53, %v1815_v15  ;;  %v1838_v18 = vsel %vm442_vm7, %v1834_v2, %v1835_v52  ;;  %v2183_v53 = vld [vmem:[#allocation8 + $0xb0] sm:$0xff]  ;;  %v2174_v2 = vld [vmem:[#allocation8 + $0x68] sm:$0xff] }
 0x40d   :  { %v1847_v63 = vmax.f32 %v1826_v27, %v1839_v19  ;;  %v1846_v14 = vmax.f32 %v1825_v61, %v1840_v54  ;;  %v1848_v28 = vmax.f32 %v1827_v51, %v1838_v18  ;;  %v3240_v59 = vpack.c.bf16 %v2184_v55, %v2183_v53  ;;  %v2185_v61 = vld [vmem:[#allocation8 + $0xc0] sm:$0xff]  ;;  %v2175_v18 = vld [vmem:[#allocation8 + $0x70] sm:$0xff] }
 0x40e   :  { %v1836_v20 = vrot.slane %v1829_v58, 2  ;;  %v3244_v40 = vpack.c.bf16 %v2186_v1, %v2185_v61  ;;  %v3250_v51 = vpack.c.bf16 %v2172_v12, %v2171_v8  ;;  %v2283_v55 = vld [vmem:[#allocation10 + $0x60] sm:$0xff]  ;;  %v2372_v8 = vld [vmem:[#allocation11 + $0x38] sm:$0xff] }
 0x40f   :  { %v3196_v23 = vpack.c.bf16 %v1847_v63, %v1846_v14  ;;  %v2192_v63 = vld [vmem:[#allocation8 + $0xf8] sm:$0xff]  ;;  %v2365_v1 = vld [vmem:[#allocation11] sm:$0xff] }
 0x410   :  { %v1837_v7 = vsel %vm442_vm7, %v1835_v52, %v1836_v20  ;;  %v1843_v29 = vsel %vm442_vm7, %v1836_v20, %v1830_v60  ;;  %v3242_v60 = vpack.c.bf16 %v2168_v57, %v2167_v62  ;;  %v2176_v20 = vld [vmem:[#allocation8 + $0x78] sm:$0xff]  ;;  %v2285_v62 = vld [vmem:[#allocation10 + $0x70] sm:$0xff] }
 0x411   :  { %v1849_v5 = vmax.f32 %v1828_v34, %v1837_v7  ;;  %3197 = vmatpush3.bf16.msra.mxu0 %v3196_v23  ;;  %3206 = vmatpush3.bf16.msra.mxu1 %v3196_v23  ;;  %v1850_v21 = vmax.f32 %v1829_v58, %v1843_v29  ;;  %v2173_v34 = vld [vmem:[#allocation8 + $0x60] sm:$0xff]  ;;  %v2191_v58 = vld [vmem:[#allocation8 + $0xf0] sm:$0xff]  ;;  %v2274_v29 = vld [vmem:[#allocation10 + $0x18] sm:$0xff] }
 0x412   :  { %3198 = vmatprep.subr.bf16.mxu0 %v3576_v25  ;;  %3207 = vmatprep.subr.bf16.mxu1 %v3576_v25  ;;  %v3254_v41 = vpack.c.bf16 %v2174_v2, %v2173_v34  ;;  %v3256_v14 = vpack.c.bf16 %v2192_v63, %v2191_v58  ;;  %v2271_v7 = vld [vmem:[#allocation10] sm:$0xff]  ;;  %v2286_v57 = vld [vmem:[#allocation10 + $0x78] sm:$0xff] }
 0x413   :  { %v3199_v22 = vpack.c.bf16 %v1849_v5, %v1848_v28  ;;  %v2272_v28 = vld [vmem:[#allocation10 + $0x8] sm:$0xff]  ;;  %v2273_v5 = vld [vmem:[#allocation10 + $0x10] sm:$0xff]  ;;  %v3282_v61 = vpack.c.bf16 %v2286_v57, %v2285_v62  ;;  %v2376_v34 = vld [vmem:[#allocation11 + $0x58] sm:$0xff] }
 0x415   :  { %3200 = vmatpush3.bf16.msra.mxu0 %v3199_v22  ;;  %3209 = vmatpush3.bf16.msra.mxu1 %v3199_v22 }
 0x416   :  { %2956 = vmatprep.subr.mxu0 %v3574_v0  ;;  %2973 = vmatprep.subr.mxu1 %v3574_v0 }
 0x419   :  { %2957 = vmatpush3.msra.mxu0 %v1850_v21  ;;  %2974 = vmatpush3.msra.mxu1 %v1850_v21 }
 0x41a   :  { %3210 = vmatprep.subr.bf16.mxu0 %v3576_v25  ;;  %3219 = vmatprep.subr.bf16.mxu1 %v3576_v25 }
 0x41b   :  { %2959 = vmatmul.mubr.msk.f32.vlgmr.msra.gmra.mrb[14].mxu0 %vm1033_vm9, %v1851_v11  ;;  %2976 = vmatmul.mubr.msk.f32.vlgmr.msra.gmra.mrb[80].mxu1 %vm1033_vm9, %v2559_v13  ;;  %v2275_v11 = vld [vmem:[#allocation10 + $0x20] sm:$0xff]  ;;  %v2276_v13 = vld [vmem:[#allocation10 + $0x28] sm:$0xff] }
 0x41c   :  { %3212 = vmatpush3.bf16.msra.mxu0 %v3193_v30  ;;  %3221 = vmatpush3.bf16.msra.mxu1 %v3193_v30  ;;  %v2190_v30 = vld [vmem:[#allocation8 + $0xe8] sm:$0xff] }
 0x41d   :  { %3213 = vmatprep.subr.bf16.mxu0 %v3576_v25  ;;  %3222 = vmatprep.subr.bf16.mxu1 %v3576_v25  ;;  %v3252_v27 = vpack.c.bf16 %v2190_v30, %v2189_v39  ;;  %v2373_v39 = vld [vmem:[#allocation11 + $0x40] sm:$0xff]  ;;  %v2374_v30 = vld [vmem:[#allocation11 + $0x48] sm:$0xff] }
 0x41e   :  { %3009 = vmatprep.mubr.msk.f32.mxu1 %vm3578_vm8, %v3574_v0  ;;  %2992 = vmatprep.mubr.msk.f32.mxu0 %vm3578_vm8, %v3574_v0 }
 0x420   :  { %3215 = vmatpush3.bf16.msra.mxu0 %v3196_v23  ;;  %3224 = vmatpush3.bf16.msra.mxu1 %v3196_v23  ;;  %v3258_v23 = vpack.c.bf16 %v2176_v20, %v2175_v18  ;;  %v2379_v20 = vld [vmem:[#allocation11 + $0x70] sm:$0xff] }
 0x421   :  { %3216 = vmatprep.subr.bf16.mxu0 %v3576_v25  ;;  %3225 = vmatprep.subr.bf16.mxu1 %v3576_v25 }
 0x424   :  { %3218 = vmatpush3.bf16.msra.mxu0 %v3199_v22  ;;  %3227 = vmatpush3.bf16.msra.mxu1 %v3199_v22  ;;  %v3261_v22 = vpack.c.bf16 %v2272_v28, %v2271_v7  ;;  %v2566_v28 = vld [vmem:[%s4448_s9] ss:$0 sm:$0xff] }
 0x425   :  { %2990 = vmatprep.subr.mxu0 %v3574_v0  ;;  %3007 = vmatprep.subr.mxu1 %v3574_v0 }
 0x428   :  { %2991 = vmatpush3.msra.mxu0 %v1850_v21  ;;  %3008 = vmatpush3.msra.mxu1 %v1850_v21  ;;  %v3264_v21 = vpack.c.bf16 %v2274_v29, %v2273_v5 }
 0x429   :  { %3010 = vmatmul.mubr.msk.f32.vlgmr.msra.gmra.mrb[82].mxu1 %vm1033_vm9, %v2563_v10  ;;  %2993 = vmatmul.mubr.msk.f32.vlgmr.msra.gmra.mrb[16].mxu0 %vm1033_vm9, %v2561_v33 }
 0x42a   :  { %3260 = vmatprep.subr.bf16.mxu1 %v3576_v25  ;;  %3044 = vmatprep.mubr.msk.f32.mxu1 %vm3578_vm8, %v3574_v0 }
 0x42b   :  { %3229 = vmatprep.subr.bf16.mxu0 %v3228_v31  ;;  %3262 = vmatpush3.bf16.msra.mxu1 %v3261_v22  ;;  %v3267_v31 = vpack.c.bf16 %v2276_v13, %v2275_v11 }
 0x42c   :  { %3231 = vmatpush3.bf16.msra.mxu0 %v3230_v26  ;;  %3263 = vmatprep.subr.bf16.mxu1 %v3576_v25  ;;  %v2279_v26 = vld [vmem:[#allocation10 + $0x40] sm:$0xff] }
 0x42d   :  { %3233 = vmatprep.subr.bf16.mxu0 %v3232_v42  ;;  %v2280_v42 = vld [vmem:[#allocation10 + $0x48] sm:$0xff] }
 0x42e   :  { %v3273_v46 = vpack.c.bf16 %v2280_v42, %v2279_v26 }
 0x42f   :  { %3265 = vmatpush3.bf16.msra.mxu1 %v3264_v21  ;;  %v2567_v21 = vld [vmem:[%s4450_s11] ss:$0 sm:$0xff] }
 0x430   :  { %3235 = vmatpush3.bf16.msra.mxu0 %v3234_v48  ;;  %3266 = vmatprep.subr.bf16.mxu1 %v3576_v25 }
 0x431   :  { %3237 = vmatprep.subr.bf16.mxu0 %v3236_v49 }
 0x433   :  { %3268 = vmatpush3.bf16.msra.mxu1 %v3267_v31 }
 0x434   :  { %3239 = vmatpush3.bf16.msra.mxu0 %v3238_v56  ;;  %3269 = vmatprep.subr.bf16.mxu1 %v3576_v25  ;;  %v2284_v56 = vld [vmem:[#allocation10 + $0x68] sm:$0xff] }
 0x435   :  { %3241 = vmatprep.subr.bf16.mxu0 %v3240_v59  ;;  %v3279_v59 = vpack.c.bf16 %v2284_v56, %v2283_v55 }
 0x437   :  { %3271 = vmatpush3.bf16.msra.mxu1 %v3270_v45 }
 0x438   :  { %3243 = vmatpush3.bf16.msra.mxu0 %v3242_v60  ;;  %3272 = vmatprep.subr.bf16.mxu1 %v3576_v25  ;;  %v2366_v60 = vld [vmem:[#allocation11 + $0x8] sm:$0xff] }
 0x439   :  { %3245 = vmatprep.subr.bf16.mxu0 %v3244_v40  ;;  %v2367_v40 = vld [vmem:[#allocation11 + $0x10] sm:$0xff]  ;;  %v3285_v17 = vpack.c.bf16 %v2366_v60, %v2365_v1 }
 0x43a   :  { %v3288_v16 = vpack.c.bf16 %v2368_v24, %v2367_v40 }
 0x43b   :  { %3274 = vmatpush3.bf16.msra.mxu1 %v3273_v46 }
 0x43c   :  { %3247 = vmatpush3.bf16.msra.mxu0 %v3246_v4  ;;  %3275 = vmatprep.subr.bf16.mxu1 %v3576_v25 }
 0x43d   :  { %3249 = vmatprep.subr.bf16.mxu0 %v3248_v6  ;;  %v2371_v6 = vld [vmem:[#allocation11 + $0x30] sm:$0xff] }
 0x43e   :  { %v3294_v12 = vpack.c.bf16 %v2372_v8, %v2371_v6 }
 0x43f   :  { %3277 = vmatpush3.bf16.msra.mxu1 %v3276_v47 }
 0x440   :  { %3251 = vmatpush3.bf16.msra.mxu0 %v3250_v51  ;;  %3278 = vmatprep.subr.bf16.mxu1 %v3576_v25  ;;  %v3297_v51 = vpack.c.bf16 %v2374_v30, %v2373_v39 }
 0x441   :  { %3253 = vmatprep.subr.bf16.mxu0 %v3252_v27  ;;  %v2375_v27 = vld [vmem:[#allocation11 + $0x50] sm:$0xff] }
 0x442   :  { %v3300_v2 = vpack.c.bf16 %v2376_v34, %v2375_v27 }
 0x443   :  { %3280 = vmatpush3.bf16.msra.mxu1 %v3279_v59 }
 0x444   :  { %3255 = vmatpush3.bf16.msra.mxu0 %v3254_v41  ;;  %3281 = vmatprep.subr.bf16.mxu1 %v3576_v25  ;;  %v2377_v41 = vld [vmem:[#allocation11 + $0x60] sm:$0xff] }
 0x445   :  { %3257 = vmatprep.subr.bf16.mxu0 %v3256_v14 }
 0x447   :  { %3283 = vmatpush3.bf16.msra.mxu1 %v3282_v61 }
 0x448   :  { %3259 = vmatpush3.bf16.msra.mxu0 %v3258_v23  ;;  %v2380_v23 = vld [vmem:[#allocation11 + $0x78] sm:$0xff] }
 0x449   :  { %3284 = vmatprep.subr.bf16.mxu0 %v3576_v25  ;;  %v3306_v7 = vpack.c.bf16 %v2380_v23, %v2379_v20 }
 0x4ee   :  { %v1996_v52 = vpop.f32.mrb[80].mxu1  ;;  %v1921_v15 = vpop.f32.mrb[14].mxu0 }
 0x4ef   :  { %v2977_v19 = vpop.f32.mrb[81].mxu1  ;;  %v2960_v54 = vpop.f32.mrb[15].mxu0 }
 0x4f0   :  { %v2565_v54 = vld [vmem:[%s4446_s7] ss:$0 sm:$0xff] }
 0x4fc   :  { %v2146_v10 = vpop.f32.mrb[82].mxu1  ;;  %v2071_v33 = vpop.f32.mrb[16].mxu0 }
 0x4fd   :  { %v3395_v36 = vpack.i.bf16 %v1996_v52, %v2146_v10  ;;  %v3011_v37 = vpop.f32.mrb[83].mxu1  ;;  %v2994_v9 = vpop.f32.mrb[17].mxu0  ;;  %v2378_v52 = vld [vmem:[#allocation11 + $0x68] sm:$0xff] }
 0x4ff   :  { %3396 = vrot.lane.b32.xlu1 %v3395_v36, %s3579_s24 }
 0x571   :  { %v3397_v48 = vpop.permute.xlu1 %3396 }
 0x572   :  { %v3399_v49 = vunpack.i.h.bf16 %v3397_v48  ;;  %v3398_v44 = vunpack.i.l.bf16 %v3397_v48 }
 0x574   :  { %v2160_v50 = vsel %vm2158_vm12, %v2071_v33, %v3398_v44  ;;  %v2159_v53 = vsel %vm2158_vm12, %v1921_v15, %v3399_v49  ;;  %v3303_v15 = vpack.c.bf16 %v2378_v52, %v2377_v41 }
 0x575   :  { %2264 = vmatprep.mubr.f32.mxu0 %v2160_v50 }
 0x576   :  { %2265 = vmatmul.mubr.f32.vlgmr.msra.gmra.mrb[18].mxu0 %v2159_v53 }
 0x577   :  { %3079 = vmatprep.mubr.msk.f32.mxu0 %vm3578_vm8, %v3574_v0  ;;  %3286 = vmatpush3.bf16.msra.mxu0 %v3285_v17  ;;  %v2369_v0 = vld [vmem:[#allocation11 + $0x20] sm:$0xff] }
 0x578   :  { %3287 = vmatprep.subr.bf16.mxu0 %v3576_v25  ;;  %v3291_v4 = vpack.c.bf16 %v2370_v3, %v2369_v0 }
 0x57b   :  { %3289 = vmatpush3.bf16.msra.mxu0 %v3288_v16 }
 0x57c   :  { %3290 = vmatprep.subr.bf16.mxu0 %v3576_v25 }
 0x57f   :  { %3292 = vmatpush3.bf16.msra.mxu0 %v3291_v4 }
 0x580   :  { %3293 = vmatprep.subr.bf16.mxu0 %v3576_v25 }
 0x583   :  { %3295 = vmatpush3.bf16.msra.mxu0 %v3294_v12 }
 0x584   :  { %3296 = vmatprep.subr.bf16.mxu0 %v3576_v25 }
 0x587   :  { %3298 = vmatpush3.bf16.msra.mxu0 %v3297_v51 }
 0x588   :  { %3299 = vmatprep.subr.bf16.mxu0 %v3576_v25 }
 0x58b   :  { %3301 = vmatpush3.bf16.msra.mxu0 %v3300_v2 }
 0x58c   :  { %3302 = vmatprep.subr.bf16.mxu0 %v3576_v25 }
 0x58f   :  { %3304 = vmatpush3.bf16.msra.mxu0 %v3303_v15 }
 0x590   :  { %3305 = vmatprep.subr.bf16.mxu0 %v3576_v25 }
 0x593   :  { %3307 = vmatpush3.bf16.msra.mxu0 %v3306_v7 }
 0x649   :  { %v2712_v19 = vpop.f32.mrb[18].mxu0 }
 0x64a   :  { %v2713_v58 = vpop.f32.mrb[19].mxu0 }
 0x64b   :  { %v2714_v63 = vadd.f32 %v2713_v58, %v2712_v19 }
 0x64d   :  { %v2267_v14 = vadd.f32 %v2714_v63, %v2565_v54 }
 0x64f   :  { %v2270_v18 = vmax.f32 %v2267_v14, 0.0 }
 0x651   :  { %3045 = vmatmul.mubr.f32.vlgmr.msra.gmra.mrb[84].mxu1 %v2270_v18 }
 0x724   :  { %v2360_v5 = vpop.f32.mrb[84].mxu1 }
 0x725   :  { %v2361_v25 = vadd.f32 %v2566_v28, %v2360_v5  ;;  %v3046_v22 = vpop.f32.mrb[85].mxu1 }
 0x727   :  { %v2364_v29 = vmax.f32 %v2361_v25, 0.0 }
 0x729   :  { %3080 = vmatmul.mubr.f32.vlgmr.msra.gmra.mrb[20].mxu0 %v2364_v29 }
 0x7fc   :  { %v2454_v11 = vpop.f32.mrb[20].mxu0 }
 0x7fd   :  { %v2455_v13 = vadd.f32 %v2567_v21, %v2454_v11  ;;  %v3081_v10 = vpop.f32.mrb[21].mxu0 }
 0x7ff   :  { %2458 = vst [vmem:[#allocation13] sm:$0x3] %v2455_v13 }
 0x800   :  { %3543 = shalt.err (!%p3540_p10)
}
 0x801   :  { %s3544_s19 = scalar_lea.hbm %s4451_s12, 32 }
 0x802   :  { %p3545_p11 = scmp.ne.s32.totalorder %s4451_s12, %s3544_s19  ;;  %p3548_p12 = scmp.lt.u32.totalorder %s3544_s19, %s4451_s12 }
 0x804   :  { %p3550_p13 = pnand %p3548_p12, %p3545_p11 }
 0x806   :  { %3553 = shalt.err (!%p3550_p13)
}
 0x807   :  { %2468 = dma.vmem_to_hbm [thread:$0]  %s2466_s17, 32, %s4451_s12, [#allocation4]  }
 0x808   :  { %3562 = dma.done.wait [#allocation4], 32  }
 0x809   :  { %3563 = vsyncadd [#allocation4], 4294967264 }
 0x80a   :  { %2472 = vsyncpa [#allocation3], 1 }
 0x80b   :  { %2473 = vsyncpa [#allocation6], 1 }
 0x80c   :  { %2474 = vsyncpa [#allocation9], 1 }
 0x80d   :  { %2475 = vsyncpa [#allocation12], 1 }
 0x80e   :  { %2476 = vsyncpa [#allocation4], 1 }

</bundles_post_ra>
